<compile_context>
chip_gen: v6e
topology: v6e:2x2x1
jax: 0.10.0
libtpu: 0.0.40
codegen_flags: <defaults>
</compile_context>

<pallas_src>
import jax
import jax.numpy as jnp
from jax.experimental import pallas as pl
from jax.experimental.pallas import tpu as pltpu

# ----- model hyper-parameters (from NgramModel.__init__) -----
VOCAB_SIZE = 256
CONTEXT_SIZE = 2
N_DIM = 32
HIDDEN = 128
FEAT = CONTEXT_SIZE * N_DIM

TILE_M = 128  # batch tile (multiple of 128 for v5e MXU; B=256 -> 2 parallel grid steps)


def ngram_kernel(idx_ref, emb_ref, w1_ref, b1_ref, w2_ref, b2_ref, out_ref):
    """One batch tile: fused gather -> linear1 -> ReLU -> linear2 -> log_softmax."""
    ids = idx_ref[...]  # (TILE_M, C) int32
    vocab_iota = jax.lax.broadcasted_iota(jnp.int32, (TILE_M, VOCAB_SIZE), 1)

    # Embedding gather as one-hot MXU matmul; flatten+linear1 folded into
    # per-context-position partial matmuls (mathematically identical).
    h1 = None
    for c in range(CONTEXT_SIZE):
        ids_c = ids[:, c:c + 1]                                   # (TILE_M, 1)
        onehot_c = (vocab_iota == ids_c).astype(jnp.bfloat16)     # (TILE_M, VOCAB)
        emb_c = jnp.dot(onehot_c, emb_ref[...],
                        preferred_element_type=jnp.float32)       # (TILE_M, N_DIM), exact bf16 rows
        w1_c = w1_ref[pl.ds(c * N_DIM, N_DIM), :]                 # (N_DIM, HIDDEN) bf16, static slice
        part = jnp.dot(emb_c.astype(jnp.bfloat16), w1_c,
                       preferred_element_type=jnp.float32)        # (TILE_M, HIDDEN) f32
        h1 = part if h1 is None else h1 + part

    # Bias + ReLU in f32 (VPU).
    h = jnp.maximum(h1 + b1_ref[...], 0.0)

    # linear2 on the bf16 MXU path, f32 accumulation + f32 bias.
    logits = jnp.dot(h.astype(jnp.bfloat16), w2_ref[...],
                     preferred_element_type=jnp.float32) + b2_ref[...]

    # log_softmax over the vocab axis (dim=1 in the PyTorch module), all f32.
    m = jnp.max(logits, axis=-1, keepdims=True)
    shifted = logits - m
    lse = jnp.log(jnp.sum(jnp.exp(shifted), axis=-1, keepdims=True))
    out_ref[...] = shifted - lse


def ngram_forward_batched(x_idx, emb_table, w1, b1, w2, b2):
    """Batched forward: (B, CONTEXT_SIZE) int32 -> (B, VOCAB_SIZE) f32 log-probs."""
    B = x_idx.shape[0]
    assert B % TILE_M == 0, "batch must be a multiple of TILE_M"
    grid = (B // TILE_M,)

    flops = int(2 * B * (CONTEXT_SIZE * VOCAB_SIZE * N_DIM + FEAT * HIDDEN + HIDDEN * VOCAB_SIZE))
    transcendentals = int(B * (VOCAB_SIZE + 1))                   # exp per logit + log per row
    bytes_accessed = int(x_idx.size * 4 + emb_table.size * 2 + w1.size * 2 + b1.size * 4
                         + w2.size * 2 + b2.size * 4 + B * VOCAB_SIZE * 4)

    return pl.pallas_call(
        ngram_kernel,
        out_shape=jax.ShapeDtypeStruct((B, VOCAB_SIZE), jnp.float32),
        grid_spec=pltpu.PrefetchScalarGridSpec(
            num_scalar_prefetch=0,
            grid=grid,
            in_specs=[
                pl.BlockSpec((TILE_M, CONTEXT_SIZE), lambda i: (i, 0)),   # per-tile token ids
                pl.BlockSpec((VOCAB_SIZE, N_DIM), lambda i: (0, 0)),      # table, VMEM-resident
                pl.BlockSpec((FEAT, HIDDEN), lambda i: (0, 0)),           # w1,    VMEM-resident
                pl.BlockSpec((1, HIDDEN), lambda i: (0, 0)),              # b1
                pl.BlockSpec((HIDDEN, VOCAB_SIZE), lambda i: (0, 0)),     # w2,    VMEM-resident
                pl.BlockSpec((1, VOCAB_SIZE), lambda i: (0, 0)),          # b2
            ],
            out_specs=pl.BlockSpec((TILE_M, VOCAB_SIZE), lambda i: (i, 0)),
        ),
        compiler_params=pltpu.CompilerParams(dimension_semantics=("parallel",)),
        cost_estimate=pl.CostEstimate(flops=flops,
                                      transcendentals=transcendentals,
                                      bytes_accessed=bytes_accessed),
    )(x_idx, emb_table, w1, b1, w2, b2)


def ngram_forward(x_idx, emb_table, w1, b1, w2, b2):
    """Exact NgramModel.forward semantics: one context (CONTEXT_SIZE,) -> (1, VOCAB) log-probs."""
    padded = jnp.zeros((TILE_M, CONTEXT_SIZE), jnp.int32).at[0].set(x_idx)
    return ngram_forward_batched(padded, emb_table, w1, b1, w2, b2)[:1]


def reference_forward_batched(x_idx, emb_table, w1, b1, w2, b2):
    """Plain-JAX reference with the same bf16 weight/activation quantization as the kernel."""
    emb = emb_table.astype(jnp.float32)[x_idx]                    # (B, C, N_DIM)
    emb_flat = emb.reshape(x_idx.shape[0], -1)                    # (B, FEAT)
    h = jnp.maximum(emb_flat @ w1.astype(jnp.float32) + b1, 0.0)
    h = h.astype(jnp.bfloat16).astype(jnp.float32)                # mirror kernel's bf16 MXU input
    logits = h @ w2.astype(jnp.float32) + b2
    return jax.nn.log_softmax(logits, axis=-1)


if __name__ == "__main__":
    key = jax.random.PRNGKey(0)
    k_emb, k_w1, k_b1, k_w2, k_b2, k_x = jax.random.split(key, 6)

    # Deterministic synthetic parameters (shapes from NgramModel.__init__).
    # Weights / embedding table stored in bf16; biases in f32.
    emb_table = (jax.random.normal(k_emb, (VOCAB_SIZE, N_DIM), jnp.float32) * 0.1).astype(jnp.bfloat16)
    w1 = (jax.random.normal(k_w1, (FEAT, HIDDEN), jnp.float32) * 0.1).astype(jnp.bfloat16)
    b1 = jax.random.normal(k_b1, (1, HIDDEN), jnp.float32) * 0.1
    w2 = (jax.random.normal(k_w2, (HIDDEN, VOCAB_SIZE), jnp.float32) * 0.1).astype(jnp.bfloat16)
    b2 = jax.random.normal(k_b2, (1, VOCAB_SIZE), jnp.float32) * 0.1

    # Batch of n-gram contexts (B = 2 * TILE_M -> 2 parallel grid steps).
    B = 2 * TILE_M
    x_batch = jax.random.randint(k_x, (B, CONTEXT_SIZE), 0, VOCAB_SIZE, jnp.int32)

    out = jax.block_until_ready(ngram_forward_batched(x_batch, emb_table, w1, b1, w2, b2))
    ref = reference_forward_batched(x_batch, emb_table, w1, b1, w2, b2)
    assert out.shape == (B, VOCAB_SIZE)
    assert jnp.allclose(out, ref, atol=2e-4, rtol=2e-4)

    # Single-context path (the original module's forward: (context,) -> (1, vocab)).
    out1 = jax.block_until_ready(ngram_forward(x_batch[0], emb_table, w1, b1, w2, b2))
    assert out1.shape == (1, VOCAB_SIZE)
    assert jnp.allclose(out1, ref[:1], atol=2e-4, rtol=2e-4)

    print("KERNEL_OK")
</pallas_src>

<mosaic_0001>
module attributes {stable_mosaic.version = 11 : i64} {
  func.func @ngram_kernel(%arg0: i32, %arg1: memref<128x2xi32, #tpu.memory_space<vmem>>, %arg2: memref<256x32xbf16, #tpu.memory_space<vmem>>, %arg3: memref<64x128xbf16, #tpu.memory_space<vmem>>, %arg4: memref<1x128xf32, #tpu.memory_space<vmem>>, %arg5: memref<128x256xbf16, #tpu.memory_space<vmem>>, %arg6: memref<1x256xf32, #tpu.memory_space<vmem>>, %arg7: memref<128x256xf32, #tpu.memory_space<vmem>>) attributes {dimension_semantics = [#tpu.dimension_semantics<parallel>], iteration_bounds = array<i64: 2>, scalar_prefetch = 0 : i64, scratch_operands = 0 : i64, tpu.core_type = #tpu.core_type<tc>, window_params = [{transform_indices = @transform_0, window_bounds = array<i64: 128, 2>}, {pipeline_mode = #tpu.pipeline_mode<synchronous>, transform_indices = @transform_1, window_bounds = array<i64: 256, 32>}, {pipeline_mode = #tpu.pipeline_mode<synchronous>, transform_indices = @transform_2, window_bounds = array<i64: 64, 128>}, {pipeline_mode = #tpu.pipeline_mode<synchronous>, transform_indices = @transform_3, window_bounds = array<i64: 1, 128>}, {pipeline_mode = #tpu.pipeline_mode<synchronous>, transform_indices = @transform_4, window_bounds = array<i64: 128, 256>}, {pipeline_mode = #tpu.pipeline_mode<synchronous>, transform_indices = @transform_5, window_bounds = array<i64: 1, 256>}, {transform_indices = @transform_6, window_bounds = array<i64: 128, 256>}]} {
    %c0 = arith.constant 0 : index
    %c0_0 = arith.constant 0 : index
    %0 = vector.load %arg1[%c0, %c0_0] : memref<128x2xi32, #tpu.memory_space<vmem>>, vector<128x2xi32>
    %1 = tpu.iota {dimensions = array<i32: 1>} : vector<128x256xi32>
    %2 = vector.extract_strided_slice %0 {offsets = [0, 0], sizes = [128, 1], strides = [1, 1]} : vector<128x2xi32> to vector<128x1xi32>
    %3 = vector.broadcast %2 : vector<128x1xi32> to vector<128x256xi32>
    %4 = arith.cmpi eq, %1, %3 : vector<128x256xi32>
    %5 = arith.extui %4 : vector<128x256xi1> to vector<128x256xi32>
    %6 = arith.sitofp %5 : vector<128x256xi32> to vector<128x256xf32>
    %7 = arith.truncf %6 : vector<128x256xf32> to vector<128x256xbf16>
    %c0_1 = arith.constant 0 : index
    %c0_2 = arith.constant 0 : index
    %8 = vector.load %arg2[%c0_1, %c0_2] : memref<256x32xbf16, #tpu.memory_space<vmem>>, vector<256x32xbf16>
    %cst = arith.constant dense<0.000000e+00> : vector<128x32xf32>
    %9 = tpu.matmul %7, %8, %cst {dimension_numbers = #tpu.dot_dimension_numbers<[1], [0], [0], [1], [0, 0, 1, 1], [], []>} : vector<128x256xbf16>, vector<256x32xbf16>, vector<128x32xf32> -> vector<128x32xf32>
    %c0_3 = arith.constant 0 : index
    %c0_4 = arith.constant 0 : index
    %10 = vector.load %arg3[%c0_3, %c0_4] : memref<64x128xbf16, #tpu.memory_space<vmem>>, vector<32x128xbf16>
    %11 = arith.truncf %9 : vector<128x32xf32> to vector<128x32xbf16>
    %cst_5 = arith.constant dense<0.000000e+00> : vector<128x128xf32>
    %12 = tpu.matmul %11, %10, %cst_5 {dimension_numbers = #tpu.dot_dimension_numbers<[1], [0], [0], [1], [0, 0, 1, 1], [], []>} : vector<128x32xbf16>, vector<32x128xbf16>, vector<128x128xf32> -> vector<128x128xf32>
    %13 = vector.extract_strided_slice %0 {offsets = [0, 1], sizes = [128, 1], strides = [1, 1]} : vector<128x2xi32> to vector<128x1xi32>
    %14 = vector.broadcast %13 : vector<128x1xi32> to vector<128x256xi32>
    %15 = arith.cmpi eq, %1, %14 : vector<128x256xi32>
    %16 = arith.extui %15 : vector<128x256xi1> to vector<128x256xi32>
    %17 = arith.sitofp %16 : vector<128x256xi32> to vector<128x256xf32>
    %18 = arith.truncf %17 : vector<128x256xf32> to vector<128x256xbf16>
    %c0_6 = arith.constant 0 : index
    %c0_7 = arith.constant 0 : index
    %19 = vector.load %arg2[%c0_6, %c0_7] : memref<256x32xbf16, #tpu.memory_space<vmem>>, vector<256x32xbf16>
    %cst_8 = arith.constant dense<0.000000e+00> : vector<128x32xf32>
    %20 = tpu.matmul %18, %19, %cst_8 {dimension_numbers = #tpu.dot_dimension_numbers<[1], [0], [0], [1], [0, 0, 1, 1], [], []>} : vector<128x256xbf16>, vector<256x32xbf16>, vector<128x32xf32> -> vector<128x32xf32>
    %c32 = arith.constant 32 : index
    %c0_9 = arith.constant 0 : index
    %21 = vector.load %arg3[%c32, %c0_9] : memref<64x128xbf16, #tpu.memory_space<vmem>>, vector<32x128xbf16>
    %22 = arith.truncf %20 : vector<128x32xf32> to vector<128x32xbf16>
    %cst_10 = arith.constant dense<0.000000e+00> : vector<128x128xf32>
    %23 = tpu.matmul %22, %21, %cst_10 {dimension_numbers = #tpu.dot_dimension_numbers<[1], [0], [0], [1], [0, 0, 1, 1], [], []>} : vector<128x32xbf16>, vector<32x128xbf16>, vector<128x128xf32> -> vector<128x128xf32>
    %24 = arith.addf %12, %23 : vector<128x128xf32>
    %c0_11 = arith.constant 0 : index
    %c0_12 = arith.constant 0 : index
    %25 = vector.load %arg4[%c0_11, %c0_12] : memref<1x128xf32, #tpu.memory_space<vmem>>, vector<1x128xf32>
    %26 = vector.broadcast %25 : vector<1x128xf32> to vector<128x128xf32>
    %27 = arith.addf %24, %26 : vector<128x128xf32>
    %cst_13 = arith.constant 0.000000e+00 : f32
    %28 = vector.broadcast %cst_13 : f32 to vector<128x128xf32>
    %29 = arith.maximumf %27, %28 : vector<128x128xf32>
    %30 = arith.truncf %29 : vector<128x128xf32> to vector<128x128xbf16>
    %c0_14 = arith.constant 0 : index
    %c0_15 = arith.constant 0 : index
    %31 = vector.load %arg5[%c0_14, %c0_15] : memref<128x256xbf16, #tpu.memory_space<vmem>>, vector<128x256xbf16>
    %cst_16 = arith.constant dense<0.000000e+00> : vector<128x256xf32>
    %32 = tpu.matmul %30, %31, %cst_16 {dimension_numbers = #tpu.dot_dimension_numbers<[1], [0], [0], [1], [0, 0, 1, 1], [], []>} : vector<128x128xbf16>, vector<128x256xbf16>, vector<128x256xf32> -> vector<128x256xf32>
    %c0_17 = arith.constant 0 : index
    %c0_18 = arith.constant 0 : index
    %33 = vector.load %arg6[%c0_17, %c0_18] : memref<1x256xf32, #tpu.memory_space<vmem>>, vector<1x256xf32>
    %34 = vector.broadcast %33 : vector<1x256xf32> to vector<128x256xf32>
    %35 = arith.addf %32, %34 : vector<128x256xf32>
    %cst_19 = arith.constant dense<0xFF800000> : vector<128xf32>
    %36 = vector.multi_reduction <maximumf>, %35, %cst_19 [1] : vector<128x256xf32> to vector<128xf32>
    %37 = vector.shape_cast %36 : vector<128xf32> to vector<128x1xf32>
    %38 = vector.broadcast %37 : vector<128x1xf32> to vector<128x256xf32>
    %39 = arith.subf %35, %38 : vector<128x256xf32>
    %40 = math.exp %39 : vector<128x256xf32>
    %cst_20 = arith.constant dense<0.000000e+00> : vector<128xf32>
    %41 = vector.multi_reduction <add>, %40, %cst_20 [1] : vector<128x256xf32> to vector<128xf32>
    %42 = vector.shape_cast %41 : vector<128xf32> to vector<128x1xf32>
    %43 = math.log %42 : vector<128x1xf32>
    %44 = vector.broadcast %43 : vector<128x1xf32> to vector<128x256xf32>
    %45 = arith.subf %39, %44 : vector<128x256xf32>
    %c0_21 = arith.constant 0 : index
    %c0_22 = arith.constant 0 : index
    %46 = vector.load %arg7[%c0_21, %c0_22] : memref<128x256xf32, #tpu.memory_space<vmem>>, vector<128x256xf32>
    tpu.vector_store %arg7[%c0_21, %c0_22], %45 {strides = array<i32>} : memref<128x256xf32, #tpu.memory_space<vmem>>, vector<128x256xf32>,
    return
  }
  func.func @transform_0(%arg0: i32) -> (i32, i32) {
    %c0_i32 = arith.constant 0 : i32
    %c0_i32_0 = arith.constant 0 : i32
    return %arg0, %c0_i32 : i32, i32
  }
  func.func @transform_1(%arg0: i32) -> (i32, i32) {
    %c0_i32 = arith.constant 0 : i32
    %c0_i32_0 = arith.constant 0 : i32
    %c0_i32_1 = arith.constant 0 : i32
    return %c0_i32, %c0_i32_0 : i32, i32
  }
  func.func @transform_2(%arg0: i32) -> (i32, i32) {
    %c0_i32 = arith.constant 0 : i32
    %c0_i32_0 = arith.constant 0 : i32
    %c0_i32_1 = arith.constant 0 : i32
    return %c0_i32, %c0_i32_0 : i32, i32
  }
  func.func @transform_3(%arg0: i32) -> (i32, i32) {
    %c0_i32 = arith.constant 0 : i32
    %c0_i32_0 = arith.constant 0 : i32
    %c0_i32_1 = arith.constant 0 : i32
    return %c0_i32, %c0_i32_0 : i32, i32
  }
  func.func @transform_4(%arg0: i32) -> (i32, i32) {
    %c0_i32 = arith.constant 0 : i32
    %c0_i32_0 = arith.constant 0 : i32
    %c0_i32_1 = arith.constant 0 : i32
    return %c0_i32, %c0_i32_0 : i32, i32
  }
  func.func @transform_5(%arg0: i32) -> (i32, i32) {
    %c0_i32 = arith.constant 0 : i32
    %c0_i32_0 = arith.constant 0 : i32
    %c0_i32_1 = arith.constant 0 : i32
    return %c0_i32, %c0_i32_0 : i32, i32
  }
  func.func @transform_6(%arg0: i32) -> (i32, i32) {
    %c0_i32 = arith.constant 0 : i32
    %c0_i32_0 = arith.constant 0 : i32
    return %arg0, %c0_i32 : i32, i32
  }
}

</mosaic_0001>

<bundles_post_ra>
// kernel: tpu_custom_call.1
= control target key start
LH: loop header
LB: loop body
LE: loop exit
PB: predicated region body
PF: predicated region fallthrough
CT: control target
= control target key end

     0   :  { %11 = vsyncpa [#allocation3], 0  ;;  %s3410_s0 = inlined_call_operand.vmem [shape: s32[256,2], index: 0, kind: input, shape index: {}]   ;;  %s3411_s1 = inlined_call_operand.vmem [shape: bf16[256,32], index: 1, kind: input, shape index: {}]   ;;  %s3412_s2 = inlined_call_operand.vmem [shape: bf16[64,128], index: 2, kind: input, shape index: {}]   ;;  %s3413_s3 = inlined_call_operand.vmem [shape: f32[1,128], index: 3, kind: input, shape index: {}]   ;;  %s3414_s4 = inlined_call_operand.vmem [shape: bf16[128,256], index: 4, kind: input, shape index: {}]   ;;  %s3415_s5 = inlined_call_operand.vmem [shape: f32[1,256], index: 5, kind: input, shape index: {}]   ;;  %s3416_s6 = inlined_call_operand.hbm [shape: f32[256,256], index: 6, kind: output, shape index: {}]  }
   0x1   :  { %13 = vsyncpa [#allocation3 + $0x1], 0  ;;  %s2540_s21 = smov 0   ;;  %s2542_s22 = smov 0  }
   0x2   :  { %s2544_s23 = smov 0   ;;  %s2546_s24 = smov 0  }
   0x3 LB: > { %s2561_s25 = sadd.s32 4294967295, %s2497_s24   ;;  %s1839_s26 = sadd.s32 4294967294, %s2497_s24   ;;  %s2497_s24 = sphi %s2546_s24, %s3422_s24   ;;  %s2493_s23 = sphi %s2544_s23, %s3421_s23   ;;  %s2489_s22 = sphi %s2542_s22, %s3420_s22   ;;  %s2485_s21 = sphi %s2540_s21, %s3419_s21  }
   0x4   : > { %s2565_s27 = sadd.s32 1, %s2497_s24   ;;  %s157_s28 = sadd.s32 1, %s2493_s23 }
   0x5   : > { %s154_s29 = ssub.s32 %s2497_s24, %s2565_s27  ;;  %p167_p0 = scmp.ne.s32.totalorder %s2493_s23, %s2489_s22 }
   0x6   : > { %p155_p1 = scmp.eq.s32.totalorder %s154_s29, 0  ;;  %p168_p2 = scmp.eq.s32.totalorder %s2561_s25, 1 }
   0x7   : > { %p173_p3 = scmp.ne.s32.totalorder %s2489_s22, %s2485_s21  ;;  %p174_p4 = scmp.eq.s32.totalorder %s1839_s26, 1 }
   0x8   : > { %s2576_s30 = scalar_select %p155_p1, %s2493_s23, %s157_s28  }
   0x9   : > { %p2578_p5 = por %p168_p2, %p167_p0  ;;  %p2582_p6 = por %p174_p4, %p173_p3 }
   0xa   : > { %p1842_p7 = scmp.ge.s32.totalorder %s2497_s24, 1  ;;  %p216_p8 = scmp.lt.s32.totalorder %s2497_s24, 3 }
   0xc   : > { %p217_p9 = pnand %p1842_p7, %p216_p8 }
   0xd   : > { %s1844_s9 = sshll.u32 (!%p217_p9), %s2561_s25, 4  ;;  %s243_s16 = sand.u32 (!%p217_p9), 1, %s2489_s22  }
   0xe   : > { %220 = sbr.rel (%p217_p9) target bundleno = 1194 (0x4aa), region = 44  ;;  %p247_p10 = scmp.lt.s32.totalorder (!%p217_p9), %s1844_s9, 31 }
   0xf   : > { %s2502_s10 = smov (!%p217_p9), [#allocation2]  }
  0x10   : > { %s2441_s11 = sshll.u32 (!%p217_p9), %s2502_s10, 4  ;;  %s2442_s11 = int_to_ptr.vmem [resolvable:$false] %s2441_s11 }
  0x11   : > { %s2443_s12 = scalar_lea.vmem (!%p217_p9), %s2442_s11, 8192 }
  0x13   : > { %v2592_v0 = vld [vmem:[%s3411_s1 + $0x78] sm:$0xff]   ;;  %v2499_v1 = vmov 0   ;;  %s3424_s9 = smov (!%p247_p10, %s1844_s9), 31  ;;  %v2607_v3 = vld [vmem:[%s3411_s1 + $0x70] sm:$0xff]   ;;  %v2619_v5 = vld [vmem:[%s3411_s1 + $0x68] sm:$0xff]   ;;  %v2500_v26 = vmov 1   ;;  %v270_v34 = vlaneseq }
  0x14   : > { %2284 = vset.pattern.permute.xlu1 %v2499_v1  ;;  %2283 = vset.pattern.permute.xlu0 %v2499_v1  ;;  %v2599_v2 = vld [vmem:[%s3411_s1 + $0x38] sm:$0xff]   ;;  %v2613_v4 = vld [vmem:[%s3411_s1 + $0x30] sm:$0xff]   ;;  %s1845_s18 = sshll.u32 %s3424_s9, 3  ;;  %v2637_v8 = vld [vmem:[%s3411_s1 + $0x28] sm:$0xff]   ;;  %v2501_v43 = vmov 1.0|1.0  }
  0x15   : > { %2223 = vmatprep.subr.bf16.mxu1 %v2592_v0  ;;  %2035 = vmatprep.subr.bf16.mxu0 %v2592_v0  ;;  %s2625_s29 = scalar_lea.vmem %s3410_s0, %s1845_s18  ;;  %v2663_v13 = vld [vmem:[%s3411_s1 + $0x60] sm:$0xff]   ;;  %v2674_v15 = vld [vmem:[%s3411_s1 + $0x58] sm:$0xff]   ;;  %v2696_v19 = vld [vmem:[%s3411_s1 + $0x50] sm:$0xff]   ;;  %v2763_v35 = vand.u32 127, %v270_v34  ;;  %s2034_s18 = sshll.u32 %s2561_s25, 12 }
  0x16   : > { %2231 = vmatpush3.bf16.msra.mxu1 %v2599_v2  ;;  %2036 = vmatpush3.bf16.msra.mxu0 %v2599_v2  ;;  %v2628_v6 = vld [vmem:[%s2625_s29 + $0x50] sm:$0xff]  ;;  %v2631_v7 = vld [vmem:[%s2625_s29 + $0x40] sm:$0xff]  ;;  %v2643_v9 = vld [vmem:[%s2625_s29 + $0x58] sm:$0xff]  ;;  %s3360_s28 = scalar_lea.hbm %s3416_s6, %s2034_s18  ;;  %s3370_s25 = scalar_lea.sflag [#allocation3], %s243_s16 }
  0x17   : > { %2224 = vmatprep.subr.bf16.mxu1 %v2607_v3  ;;  %2037 = vmatprep.subr.bf16.mxu0 %v2607_v3  ;;  %v2646_v10 = vld [vmem:[%s2625_s29 + $0x48] sm:$0xff]  ;;  %v2658_v12 = vld [vmem:[%s2625_s29 + $0x60] sm:$0xff]  ;;  %v2678_v16 = vld [vmem:[%s2625_s29 + $0x78] sm:$0xff]  ;;  %v2766_v38 = vadd.s32 128, %v2763_v35 }
  0x18   : > { %304 = vperm.xlu1 %2284, %v2628_v6   ;;  %298 = vperm.xlu0 %2283, %v2631_v7   ;;  %v2651_v11 = vld [vmem:[%s2625_s29 + $0x68] sm:$0xff]  ;;  %v2668_v14 = vld [vmem:[%s3411_s1 + $0x20] sm:$0xff]   ;;  %v2684_v17 = vld [vmem:[%s3411_s1 + $0x18] sm:$0xff]  }
  0x19   : > { %v2690_v18 = vld [vmem:[%s2625_s29 + $0x70] sm:$0xff]  ;;  %v255_v20 = vld [vmem:[%s2625_s29 + $0x8] sm:$0xff]  ;;  %v254_v22 = vld [vmem:[%s2625_s29] sm:$0xff] }
  0x1a   : > { %2232 = vmatpush3.bf16.msra.mxu1 %v2613_v4  ;;  %2038 = vmatpush3.bf16.msra.mxu0 %v2613_v4  ;;  %v2704_v21 = vld [vmem:[%s3411_s1 + $0x10] sm:$0xff]   ;;  %v2713_v23 = vld [vmem:[%s3411_s1 + $0x48] sm:$0xff]   ;;  %v2725_v25 = vld [vmem:[%s3411_s1 + $0x40] sm:$0xff]  }
  0x1b   : > { %2225 = vmatprep.subr.bf16.mxu1 %v2619_v5  ;;  %2039 = vmatprep.subr.bf16.mxu0 %v2619_v5  ;;  %v2719_v24 = vld [vmem:[%s3411_s1 + $0x8] sm:$0xff]   ;;  %v2733_v27 = vld [vmem:[%s3411_s1] sm:$0xff]   ;;  %v256_v28 = vld [vmem:[%s2625_s29 + $0x10] sm:$0xff] }
  0x1c   : > { %307 = vperm.xlu1 %2284, %v2643_v9   ;;  %301 = vperm.xlu0 %2283, %v2646_v10   ;;  %v257_v29 = vld [vmem:[%s2625_s29 + $0x18] sm:$0xff]  ;;  %v258_v30 = vld [vmem:[%s2625_s29 + $0x20] sm:$0xff]  ;;  %v259_v31 = vld [vmem:[%s2625_s29 + $0x28] sm:$0xff] }
  0x1d   : > { %v261_v32 = vld [vmem:[%s2625_s29 + $0x38] sm:$0xff]  ;;  %v260_v33 = vld [vmem:[%s2625_s29 + $0x30] sm:$0xff]  ;;  %v2313_v55 = vld [vmem:[%s3412_s2 + $0x8] sm:$0xff]   ;;  %s1843_s29 = sshll.u32 %s243_s16, 8 }
  0x1e   : > { %2233 = vmatpush3.bf16.msra.mxu1 %v2637_v8  ;;  %2040 = vmatpush3.bf16.msra.mxu0 %v2637_v8  ;;  %s3295_s17 = scalar_lea.vmem [#allocation2], %s1843_s29 }
  0x1f   : > { %2226 = vmatprep.subr.bf16.mxu1 %v2663_v13  ;;  %2041 = vmatprep.subr.bf16.mxu0 %v2663_v13  ;;  %s1777_s19 = sshll.u32 %s3295_s17, 4  ;;  %s3362_s19 = int_to_ptr.vmem [resolvable:$true] %s1777_s19 }
  0x20   : > { %313 = vperm.xlu1 %2284, %v2651_v11   ;;  %310 = vperm.xlu0 %2283, %v2658_v12   ;;  %s2437_s9 = scalar_lea.vmem %s3362_s19, 4096  ;;  %p2444_p0 = scmp.lt.s32.totalorder %s3362_s19, %s2442_s11 }
  0x21   : > { %p2438_p11 = scmp.ne.s32.totalorder %s3362_s19, %s2437_s9  ;;  %p2445_p1 = scmp.lt.s32.totalorder %s2443_s12, %s2437_s9 }
  0x22   : > { %2234 = vmatpush3.bf16.msra.mxu1 %v2668_v14  ;;  %2042 = vmatpush3.bf16.msra.mxu0 %v2668_v14 }
  0x23   : > { %2227 = vmatprep.subr.bf16.mxu1 %v2674_v15  ;;  %2043 = vmatprep.subr.bf16.mxu0 %v2674_v15  ;;  %p2439_p12 = pnand %p2438_p11, %p2578_p5  ;;  %p2446_p2 = por %p2445_p1, %p2444_p0 }
  0x24   : > { %319 = vperm.xlu1 %2284, %v2678_v16   ;;  %316 = vperm.xlu0 %2283, %v2690_v18  }
  0x25   : > { %p2440_p13 = pneg %p2439_p12 }
  0x26   : > { %2235 = vmatpush3.bf16.msra.mxu1 %v2684_v17  ;;  %2044 = vmatpush3.bf16.msra.mxu0 %v2684_v17 }
  0x27   : > { %2228 = vmatprep.subr.bf16.mxu1 %v2696_v19  ;;  %2045 = vmatprep.subr.bf16.mxu0 %v2696_v19  ;;  %p2447_p3 = pnand %p2446_p2, %p2440_p13 }
  0x28   : > { %2285 = vset.pattern.permute.xlu0 %v2500_v26  ;;  %277 = vperm.xlu1 %2284, %v255_v20  }
  0x29   : > { %671 = vperm.xlu0 %2285, %v254_v22  }
  0x2a   : > { %2236 = vmatpush3.bf16.msra.mxu1 %v2704_v21  ;;  %2046 = vmatpush3.bf16.msra.mxu0 %v2704_v21 }
  0x2b   : > { %2229 = vmatprep.subr.bf16.mxu1 %v2713_v23  ;;  %2047 = vmatprep.subr.bf16.mxu0 %v2713_v23 }
  0x2c   : > { %2287 = vset.pattern.permute.xlu1 %v2500_v26 }
  0x2d   : > { %674 = vperm.xlu1 %2287, %v255_v20   ;;  %2286 = vset.pattern.permute.xlu0 %v2499_v1 }
  0x2e   : > { %2237 = vmatpush3.bf16.msra.mxu1 %v2719_v24  ;;  %2048 = vmatpush3.bf16.msra.mxu0 %v2719_v24 }
  0x2f   : > { %2230 = vmatprep.subr.bf16.mxu1 %v2725_v25  ;;  %274 = vperm.xlu0 %2286, %v254_v22  }
  0x30   : > { %2049 = vmatprep.subr.bf16.mxu0 %v2725_v25 }
  0x31   : > { %2288 = vset.pattern.permute.xlu1 %v2499_v1 }
  0x32   : > { %2238 = vmatpush3.bf16.msra.mxu1 %v2733_v27  ;;  %2050 = vmatpush3.bf16.msra.mxu0 %v2733_v27 }
  0x33   : > { %2099 = vmatprep.subr.bf16.mxu1 %v2592_v0  ;;  %280 = vperm.xlu1 %2288, %v256_v28  }
  0x34   : > { %283 = vperm.xlu0 %2286, %v257_v29  }
  0x37   : > { %2289 = vset.pattern.permute.xlu1 %v2500_v26 }
  0x38   : > { %286 = vperm.xlu0 %2286, %v258_v30   ;;  %677 = vperm.xlu1 %2289, %v256_v28  }
  0x3c   : > { %2291 = vset.pattern.permute.xlu0 %v2500_v26  ;;  %680 = vperm.xlu1 %2289, %v257_v29  }
  0x3d   : > { %683 = vperm.xlu0 %2291, %v258_v30  }
  0x40   : > { %2290 = vset.pattern.permute.xlu1 %v2499_v1 }
  0x41   : > { %2294 = vset.pattern.permute.xlu0 %v2499_v1  ;;  %289 = vperm.xlu1 %2290, %v259_v31  }
  0x42   : > { %295 = vperm.xlu0 %2294, %v261_v32  }
  0x45   : > { %2292 = vset.pattern.permute.xlu1 %v2500_v26 }
  0x46   : > { %2296 = vset.pattern.permute.xlu0 %v2500_v26  ;;  %686 = vperm.xlu1 %2292, %v259_v31  }
  0x47   : > { %695 = vperm.xlu0 %2296, %v2631_v7  }
  0x4a   : > { %2293 = vset.pattern.permute.xlu1 %v2499_v1 }
  0x4b   : > { %704 = vperm.xlu0 %2296, %v2643_v9   ;;  %292 = vperm.xlu1 %2293, %v260_v33   ;;  %v2315_v9 = vld [vmem:[%s3412_s2] sm:$0xff]  }
  0x4f   : > { %710 = vperm.xlu0 %2296, %v2651_v11   ;;  %2295 = vset.pattern.permute.xlu1 %v2500_v26  ;;  %v2319_v11 = vld [vmem:[%s3414_s4 + $0x74] ss:$8 sps:$4 sm:$0xff]  }
  0x50   : > { %689 = vperm.xlu1 %2295, %v260_v33  }
  0x53   : > { %716 = vperm.xlu0 %2296, %v2678_v16  }
  0x54   : > { %692 = vperm.xlu1 %2295, %v261_v32  }
  0x58   : > { %698 = vperm.xlu1 %2295, %v2646_v10   ;;  %v2316_v10 = vld [vmem:[%s3412_s2 + $0x10] sm:$0xff]  }
  0x5c   : > { %701 = vperm.xlu1 %2295, %v2628_v6  }
  0x60   : > { %707 = vperm.xlu1 %2295, %v2658_v12  }
  0x64   : > { %713 = vperm.xlu1 %2295, %v2690_v18  }
  0x93   : > { %v305_v36 = vpop.permute.xlu1 %304  ;;  %v299_v37 = vpop.permute.xlu0 %298 }
  0x94   : > { %vm337_vm2 = vcmp.eq.s32.totalorder %v2763_v35, %v299_v37  ;;  %vm338_vm5 = vcmp.eq.s32.totalorder %v2766_v38, %v299_v37  ;;  %vm342_vm7 = vcmp.eq.s32.totalorder %v2766_v38, %v305_v36  ;;  %vm341_vm12 = vcmp.eq.s32.totalorder %v2763_v35, %v305_v36 }
  0x97   : > { %v308_v39 = vpop.permute.xlu1 %307  ;;  %v302_v40 = vpop.permute.xlu0 %301 }
  0x98   : > { %vm339_vm0 = vcmp.eq.s32.totalorder %v2763_v35, %v302_v40  ;;  %vm340_vm1 = vcmp.eq.s32.totalorder %v2766_v38, %v302_v40  ;;  %vm344_vm3 = vcmp.eq.s32.totalorder %v2766_v38, %v308_v39  ;;  %vm343_vm9 = vcmp.eq.s32.totalorder %v2763_v35, %v308_v39 }
  0x99   : > { %vm1912_vm4 = vmpackc.low %vm339_vm0, %vm337_vm2 }
  0x9a   : > { %vm1910_vm6 = vmpackc.low %vm340_vm1, %vm338_vm5 }
  0x9b   : > { %v314_v41 = vpop.permute.xlu1 %313  ;;  %v311_v42 = vpop.permute.xlu0 %310  ;;  %1911 = vmatprep.mubr.msk.bf16.mxu1 %vm1910_vm6, %v2501_v43  ;;  %vm1914_vm8 = vmpackc.low %vm344_vm3, %vm342_vm7 }
  0x9c   : > { %1913 = vmatmul.mubr.msk.bf16.vlgmr.msra.gmra.mxu1 %vm1912_vm4, %v2501_v43  ;;  %vm348_vm10 = vcmp.eq.s32.totalorder %v2766_v38, %v314_v41  ;;  %vm346_vm11 = vcmp.eq.s32.totalorder %v2766_v38, %v311_v42  ;;  %vm1916_vm13 = vmpackc.low %vm343_vm9, %vm341_vm12  ;;  %vm347_vm15 = vcmp.eq.s32.totalorder %v2763_v35, %v314_v41  ;;  %vm345_vm0 = vcmp.eq.s32.totalorder %v2763_v35, %v311_v42 }
  0x9d   : > { %2100 = vmatpush3.bf16.msra.mxu1 %v2599_v2  ;;  %1915 = vmatprep.mubr.msk.bf16.mxu1 %vm1914_vm8, %v2501_v43  ;;  %vm1918_vm14 = vmpackc.low %vm348_vm10, %vm346_vm11 }
  0x9e   : > { %2101 = vmatprep.subr.bf16.mxu1 %v2607_v3  ;;  %vm1920_vm3 = vmpackc.low %vm347_vm15, %vm345_vm0 }
  0x9f   : > { %v320_v44 = vpop.permute.xlu1 %319  ;;  %v317_v45 = vpop.permute.xlu0 %316 }
  0xa0   : > { %vm352_vm4 = vcmp.eq.s32.totalorder %v2766_v38, %v320_v44  ;;  %vm350_vm5 = vcmp.eq.s32.totalorder %v2766_v38, %v317_v45  ;;  %vm349_vm15 = vcmp.eq.s32.totalorder %v2763_v35, %v317_v45 }
  0xa1   : > { %2102 = vmatpush3.bf16.msra.mxu1 %v2613_v4  ;;  %vm1922_vm10 = vmpackc.low %vm352_vm4, %vm350_vm5 }
  0xa2   : > { %2103 = vmatprep.subr.bf16.mxu1 %v2619_v5 }
  0xa3   : > { %v278_v46 = vpop.permute.xlu1 %277 }
  0xa4   : > { %v672_v47 = vpop.permute.xlu0 %671  ;;  %1917 = vmatmul.mubr.msk.bf16.gmra.mxu1 %vm1916_vm13, %v2501_v43  ;;  %vm323_vm6 = vcmp.eq.s32.totalorder %v2763_v35, %v278_v46  ;;  %vm324_vm8 = vcmp.eq.s32.totalorder %v2766_v38, %v278_v46 }
  0xa5   : > { %2104 = vmatpush3.bf16.msra.mxu1 %v2637_v8  ;;  %1919 = vmatprep.mubr.msk.bf16.mxu1 %vm1918_vm14, %v2501_v43  ;;  %vm351_vm14 = vcmp.eq.s32.totalorder %v2763_v35, %v320_v44  ;;  %vm719_vm0 = vcmp.eq.s32.totalorder %v2766_v38, %v672_v47  ;;  %v2314_v8 = vld [vmem:[%s3412_s2 + $0x18] sm:$0xff]  }
  0xa6   : > { %2105 = vmatprep.subr.bf16.mxu1 %v2663_v13  ;;  %vm1924_vm4 = vmpackc.low %vm351_vm14, %vm349_vm15  ;;  %2183 = vmatprep.subr.bf16.mxu0 %v2314_v8 }
  0xa8   : > { %v675_v48 = vpop.permute.xlu1 %674 }
  0xa9   : > { %2106 = vmatpush3.bf16.msra.mxu1 %v2668_v14 }
  0xaa   : > { %v275_v49 = vpop.permute.xlu0 %274  ;;  %2107 = vmatprep.subr.bf16.mxu1 %v2674_v15 }
  0xab   : > { %vm321_vm1 = vcmp.eq.s32.totalorder %v2763_v35, %v275_v49  ;;  %vm322_vm2 = vcmp.eq.s32.totalorder %v2766_v38, %v275_v49 }
  0xac   : > { %vm1896_vm7 = vmpackc.low %vm323_vm6, %vm321_vm1  ;;  %1921 = vmatmul.mubr.msk.bf16.gmra.mxu1 %vm1920_vm3, %v2501_v43  ;;  %vm721_vm1 = vcmp.eq.s32.totalorder %v2766_v38, %v675_v48 }
  0xad   : > { %vm1894_vm9 = vmpackc.low %vm324_vm8, %vm322_vm2  ;;  %2108 = vmatpush3.bf16.msra.mxu1 %v2684_v17  ;;  %1923 = vmatprep.mubr.msk.bf16.mxu1 %vm1922_vm10, %v2501_v43  ;;  %vm720_vm8 = vcmp.eq.s32.totalorder %v2763_v35, %v675_v48 }
  0xae   : > { %v281_v50 = vpop.permute.xlu1 %280  ;;  %1895 = vmatprep.mubr.msk.bf16.mxu0 %vm1894_vm9, %v2501_v43  ;;  %2109 = vmatprep.subr.bf16.mxu1 %v2696_v19  ;;  %vm1958_vm5 = vmpackc.low %vm721_vm1, %vm719_vm0 }
  0xaf   : > { %v284_v51 = vpop.permute.xlu0 %283  ;;  %vm326_vm11 = vcmp.eq.s32.totalorder %v2766_v38, %v281_v50  ;;  %1897 = vmatmul.mubr.msk.bf16.vlgmr.msra.gmra.mxu0 %vm1896_vm7, %v2501_v43  ;;  %vm325_vm2 = vcmp.eq.s32.totalorder %v2763_v35, %v281_v50  ;;  %vm718_vm7 = vcmp.eq.s32.totalorder %v2763_v35, %v672_v47 }
  0xb0   : > { %vm328_vm12 = vcmp.eq.s32.totalorder %v2766_v38, %v284_v51  ;;  %vm327_vm3 = vcmp.eq.s32.totalorder %v2763_v35, %v284_v51  ;;  %vm1960_vm10 = vmpackc.low %vm720_vm8, %vm718_vm7  ;;  %2184 = vmatpush3.bf16.msra.mxu0 %v2314_v8 }
  0xb1   : > { %vm1898_vm13 = vmpackc.low %vm328_vm12, %vm326_vm11  ;;  %2110 = vmatpush3.bf16.msra.mxu1 %v2704_v21  ;;  %2185 = vmatprep.subr.bf16.mxu0 %v2316_v10 }
  0xb2   : > { %1899 = vmatprep.mubr.msk.bf16.mxu0 %vm1898_vm13, %v2501_v43  ;;  %2111 = vmatprep.subr.bf16.mxu1 %v2713_v23  ;;  %vm1900_vm6 = vmpackc.low %vm327_vm3, %vm325_vm2 }
  0xb3   : > { %v678_v52 = vpop.permute.xlu1 %677  ;;  %v287_v54 = vpop.permute.xlu0 %286 }
  0xb4   : > { %1925 = vmatmul.mubr.msk.bf16.gmra.mxu1 %vm1924_vm4, %v2501_v43  ;;  %vm723_vm11 = vcmp.eq.s32.totalorder %v2766_v38, %v678_v52  ;;  %vm330_vm13 = vcmp.eq.s32.totalorder %v2766_v38, %v287_v54  ;;  %vm329_vm0 = vcmp.eq.s32.totalorder %v2763_v35, %v287_v54  ;;  %2186 = vmatpush3.bf16.msra.mxu0 %v2316_v10 }
  0xb5   : > { %2112 = vmatpush3.bf16.msra.mxu1 %v2719_v24  ;;  %1959 = vmatprep.mubr.msk.bf16.mxu1 %vm1958_vm5, %v2501_v43 }
  0xb6   : > { %2113 = vmatprep.subr.bf16.mxu1 %v2725_v25  ;;  %1361 = vmatprep.subr.bf16.mxu0 %v2319_v11 }
  0xb7   : > { %v681_v53 = vpop.permute.xlu1 %680  ;;  %1901 = vmatmul.mubr.msk.bf16.gmra.mxu0 %vm1900_vm6, %v2501_v43  ;;  %vm722_vm6 = vcmp.eq.s32.totalorder %v2763_v35, %v678_v52 }
  0xb8   : > { %vm725_vm9 = vcmp.eq.s32.totalorder %v2766_v38, %v681_v53  ;;  %v684_v57 = vpop.permute.xlu0 %683  ;;  %vm724_vm5 = vcmp.eq.s32.totalorder %v2763_v35, %v681_v53 }
  0xb9   : > { %2114 = vmatpush3.bf16.msra.mxu1 %v2733_v27  ;;  %vm1962_vm12 = vmpackc.low %vm725_vm9, %vm723_vm11  ;;  %vm727_vm4 = vcmp.eq.s32.totalorder %v2766_v38, %v684_v57 }
  0xba   : > { %2203 = vmatprep.subr.bf16.mxu1 %v2313_v55  ;;  %vm1964_vm9 = vmpackc.low %vm724_vm5, %vm722_vm6 }
  0xbc   : > { %v290_v56 = vpop.permute.xlu1 %289  ;;  %1961 = vmatmul.mubr.msk.bf16.vlgmr.msra.gmra.mxu1 %vm1960_vm10, %v2501_v43 }
  0xbd   : > { %vm331_vm14 = vcmp.eq.s32.totalorder %v2763_v35, %v290_v56  ;;  %vm332_vm15 = vcmp.eq.s32.totalorder %v2766_v38, %v290_v56  ;;  %1963 = vmatprep.mubr.msk.bf16.mxu1 %vm1962_vm12, %v2501_v43  ;;  %2204 = vmatpush3.bf16.msra.mxu1 %v2313_v55  ;;  %v296_v59 = vpop.permute.xlu0 %295 }
  0xbe   : > { %vm1902_vm1 = vmpackc.low %vm332_vm15, %vm330_vm13  ;;  %vm336_vm8 = vcmp.eq.s32.totalorder %v2766_v38, %v296_v59  ;;  %vm335_vm10 = vcmp.eq.s32.totalorder %v2763_v35, %v296_v59  ;;  %2205 = vmatprep.subr.bf16.mxu1 %v2315_v9 }
  0xbf   : > { %vm1904_vm2 = vmpackc.low %vm331_vm14, %vm329_vm0  ;;  %1903 = vmatprep.mubr.msk.bf16.mxu0 %vm1902_vm1, %v2501_v43  ;;  %vm726_vm0 = vcmp.eq.s32.totalorder %v2763_v35, %v684_v57 }
  0xc0   : > { %1905 = vmatmul.mubr.msk.bf16.gmra.mxu0 %vm1904_vm2, %v2501_v43 }
  0xc1   : > { %v687_v58 = vpop.permute.xlu1 %686  ;;  %2206 = vmatpush3.bf16.msra.mxu1 %v2315_v9 }
  0xc2   : > { %vm729_vm3 = vcmp.eq.s32.totalorder %v2766_v38, %v687_v58  ;;  %vm728_vm15 = vcmp.eq.s32.totalorder %v2763_v35, %v687_v58  ;;  %v696_v63 = vpop.permute.xlu0 %695 }
  0xc3   : > { %vm1966_vm7 = vmpackc.low %vm729_vm3, %vm727_vm4  ;;  %vm735_vm5 = vcmp.eq.s32.totalorder %v2766_v38, %v696_v63 }
  0xc4   : > { %1965 = vmatmul.mubr.msk.bf16.gmra.mxu1 %vm1964_vm9, %v2501_v43  ;;  %vm1968_vm1 = vmpackc.low %vm728_vm15, %vm726_vm0 }
  0xc5   : > { %1967 = vmatprep.mubr.msk.bf16.mxu1 %vm1966_vm7, %v2501_v43 }
  0xc6   : > { %v293_v60 = vpop.permute.xlu1 %292  ;;  %v705_v3 = vpop.permute.xlu0 %704 }
  0xc7   : > { %vm333_vm11 = vcmp.eq.s32.totalorder %v2763_v35, %v293_v60  ;;  %vm334_vm12 = vcmp.eq.s32.totalorder %v2766_v38, %v293_v60 }
  0xc8   : > { %vm1906_vm13 = vmpackc.low %vm336_vm8, %vm334_vm12 }
  0xc9   : > { %vm1908_vm14 = vmpackc.low %vm335_vm10, %vm333_vm11  ;;  %1907 = vmatprep.mubr.msk.bf16.mxu0 %vm1906_vm13, %v2501_v43  ;;  %vm734_vm11 = vcmp.eq.s32.totalorder %v2763_v35, %v696_v63  ;;  %vm741_vm13 = vcmp.eq.s32.totalorder %v2766_v38, %v705_v3 }
  0xca   : > { %1909 = vmatmul.mubr.msk.bf16.gmra.mxu0 %vm1908_vm14, %v2501_v43  ;;  %v711_v5 = vpop.permute.xlu0 %710 }
  0xcb   : > { %v690_v61 = vpop.permute.xlu1 %689 }
  0xcc   : > { %1969 = vmatmul.mubr.msk.bf16.gmra.mxu1 %vm1968_vm1, %v2501_v43  ;;  %vm731_vm2 = vcmp.eq.s32.totalorder %v2766_v38, %v690_v61  ;;  %vm730_vm8 = vcmp.eq.s32.totalorder %v2763_v35, %v690_v61  ;;  %vm740_vm1 = vcmp.eq.s32.totalorder %v2763_v35, %v705_v3 }
  0xce   : > { %v717_v7 = vpop.permute.xlu0 %716 }
  0xcf   : > { %v693_v62 = vpop.permute.xlu1 %692 }
  0xd0   : > { %vm733_vm3 = vcmp.eq.s32.totalorder %v2766_v38, %v693_v62  ;;  %vm732_vm6 = vcmp.eq.s32.totalorder %v2763_v35, %v693_v62 }
  0xd1   : > { %vm1970_vm4 = vmpackc.low %vm733_vm3, %vm731_vm2 }
  0xd2   : > { %1971 = vmatprep.mubr.msk.bf16.mxu1 %vm1970_vm4, %v2501_v43  ;;  %vm1972_vm10 = vmpackc.low %vm732_vm6, %vm730_vm8  ;;  %vm745_vm4 = vcmp.eq.s32.totalorder %v2766_v38, %v711_v5 }
  0xd3   : > { %v699_v0 = vpop.permute.xlu1 %698 }
  0xd4   : > { %vm737_vm7 = vcmp.eq.s32.totalorder %v2766_v38, %v699_v0  ;;  %1973 = vmatmul.mubr.msk.bf16.gmra.mxu1 %vm1972_vm10, %v2501_v43  ;;  %vm736_vm12 = vcmp.eq.s32.totalorder %v2763_v35, %v699_v0  ;;  %vm749_vm10 = vcmp.eq.s32.totalorder %v2766_v38, %v717_v7 }
  0xd5   : > { %vm1974_vm9 = vmpackc.low %vm737_vm7, %vm735_vm5 }
  0xd6   : > { %1975 = vmatprep.mubr.msk.bf16.mxu1 %vm1974_vm9, %v2501_v43  ;;  %vm1976_vm15 = vmpackc.low %vm736_vm12, %vm734_vm11  ;;  %vm744_vm9 = vcmp.eq.s32.totalorder %v2763_v35, %v711_v5 }
  0xd7   : > { %v702_v2 = vpop.permute.xlu1 %701 }
  0xd8   : > { %vm739_vm14 = vcmp.eq.s32.totalorder %v2766_v38, %v702_v2  ;;  %vm738_vm2 = vcmp.eq.s32.totalorder %v2763_v35, %v702_v2 }
  0xd9   : > { %vm1978_vm0 = vmpackc.low %vm741_vm13, %vm739_vm14  ;;  %vm748_vm14 = vcmp.eq.s32.totalorder %v2763_v35, %v717_v7 }
  0xda   : > { %vm1980_vm5 = vmpackc.low %vm740_vm1, %vm738_vm2 }
  0xdb   : > { %v708_v4 = vpop.permute.xlu1 %707 }
  0xdc   : > { %1977 = vmatmul.mubr.msk.bf16.gmra.mxu1 %vm1976_vm15, %v2501_v43  ;;  %vm743_vm3 = vcmp.eq.s32.totalorder %v2766_v38, %v708_v4  ;;  %vm742_vm7 = vcmp.eq.s32.totalorder %v2763_v35, %v708_v4  ;;  %v2317_v4 = vld [vmem:[%s3414_s4 + $0x70] ss:$8 sps:$4 sm:$0xff]  }
  0xdd   : > { %1979 = vmatprep.mubr.msk.bf16.mxu1 %vm1978_vm0, %v2501_v43  ;;  %vm1982_vm6 = vmpackc.low %vm745_vm4, %vm743_vm3  ;;  %vm951_vm0 = vcmask 261120  }
  0xde   : > { %vm1984_vm11 = vmpackc.low %vm744_vm9, %vm742_vm7 }
  0xdf   : > { %v714_v6 = vpop.permute.xlu1 %713 }
  0xe0   : > { %vm747_vm8 = vcmp.eq.s32.totalorder %v2766_v38, %v714_v6  ;;  %vm746_vm13 = vcmp.eq.s32.totalorder %v2763_v35, %v714_v6 }
  0xe1   : > { %vm1986_vm12 = vmpackc.low %vm749_vm10, %vm747_vm8 }
  0xe2   : > { %vm1988_vm15 = vmpackc.low %vm748_vm14, %vm746_vm13 }
  0xe4   : > { %1981 = vmatmul.mubr.msk.bf16.gmra.mxu1 %vm1980_vm5, %v2501_v43 }
  0xe5   : > { %1983 = vmatprep.mubr.msk.bf16.mxu1 %vm1982_vm6, %v2501_v43 }
  0xec   : > { %1985 = vmatmul.mubr.msk.bf16.gmra.mxu1 %vm1984_vm11, %v2501_v43 }
  0xed   : > { %1987 = vmatprep.mubr.msk.bf16.mxu1 %vm1986_vm12, %v2501_v43 }
  0xf4   : > { %1989 = vmatmul.mubr.msk.bf16.gmra.mxu1 %vm1988_vm15, %v2501_v43 }
 0x15c   : > { %v2894_v12 = vpop.f32.mrf.mxu1 }
 0x15e   : > { %v2896_v13 = vpop.f32.mrf.mxu1 }
 0x15f   : > { %v2077_v11 = vadd.f32 %v2896_v13, %v2894_v12 }
 0x160   : > { %v2078_v14 = vpop.f32.mrf.mxu1 }
 0x162   : > { %v2079_v15 = vpop.f32.mrf.mxu1 }
 0x163   : > { %v2080_v5 = vadd.f32 %v2079_v15, %v2078_v14 }
 0x164   : > { %v2898_v16 = vpop.f32.mrf.mxu1 }
 0x166   : > { %v2900_v17 = vpop.f32.mrf.mxu1 }
 0x168   : > { %v2902_v18 = vpop.f32.mrf.mxu1 }
 0x16a   : > { %v2904_v19 = vpop.f32.mrf.mxu1 }
 0x16b   : > { %v2086_v14 = vadd.f32 %v2904_v19, %v2902_v18 }
 0x16c   : > { %v2906_v20 = vpop.f32.mrf.mxu1 }
 0x16e   : > { %v2908_v22 = vpop.f32.mrf.mxu1 }
 0x16f   : > { %v2051_v21 = vpop.f32.mrf.mxu0 }
 0x170   : > { %v2910_v24 = vpop.f32.mrf.mxu1 }
 0x171   : > { %v2052_v23 = vpop.f32.mrf.mxu0 }
 0x172   : > { %v2912_v26 = vpop.f32.mrf.mxu1  ;;  %v2053_v29 = vadd.f32 %v2052_v23, %v2051_v21 }
 0x173   : > { %v2054_v25 = vpop.f32.mrf.mxu0  ;;  %v2092_v12 = vadd.f32 %v2912_v26, %v2910_v24 }
 0x174   : > { %v2914_v28 = vpop.f32.mrf.mxu1 }
 0x175   : > { %v2055_v27 = vpop.f32.mrf.mxu0 }
 0x176   : > { %v2056_v30 = vadd.f32 %v2055_v27, %v2054_v25  ;;  %v2916_v32 = vpop.f32.mrf.mxu1  ;;  %v666_v25 = vpack.c.bf16 %v2080_v5, %v2077_v11  ;;  %v2326_v5 = vld [vmem:[%s3414_s4 + $0x40] ss:$8 sps:$4 sm:$0xff]   ;;  %v2337_v11 = vld [vmem:[%s3414_s4 + $0x14] ss:$8 sps:$4 sm:$0xff]  }
 0x177   : > { %v2057_v31 = vpop.f32.mrf.mxu0 }
 0x178   : > { %v662_v33 = vpack.c.bf16 %v2056_v30, %v2053_v29  ;;  %v2918_v36 = vpop.f32.mrf.mxu1 }
 0x179   : > { %v2058_v35 = vpop.f32.mrf.mxu0 }
 0x17a   : > { %2207 = vmatprep.mubr.msk.bf16.mxu1 %vm951_vm0, %v662_v33  ;;  %v2921_v38 = vpop.f32.mrf.mxu1  ;;  %v2059_v41 = vadd.f32 %v2058_v35, %v2057_v31  ;;  %v2083_v31 = vadd.f32 %v2900_v17, %v2898_v16  ;;  %v2089_v35 = vadd.f32 %v2908_v22, %v2906_v20  ;;  %v2095_v20 = vadd.f32 %v2916_v32, %v2914_v28 }
 0x17b   : > { %v2060_v37 = vpop.f32.mrf.mxu0  ;;  %v2098_v24 = vadd.f32 %v2921_v38, %v2918_v36 }
 0x17c   : > { %v2115_v40 = vpop.f32.mrf.mxu1 }
 0x17d   : > { %v2061_v39 = vpop.f32.mrf.mxu0  ;;  %v669_v26 = vpack.c.bf16 %v2098_v24, %v2095_v20 }
 0x17e   : > { %v2062_v42 = vadd.f32 %v2061_v39, %v2060_v37  ;;  %v2116_v43 = vpop.f32.mrf.mxu1  ;;  %v667_v37 = vpack.c.bf16 %v2086_v14, %v2083_v31 }
 0x17f   : > { %v2117_v50 = vadd.f32 %v2116_v43, %v2115_v40  ;;  %v668_v40 = vpack.c.bf16 %v2092_v12, %v2089_v35 }
 0x180   : > { %v2063_v44 = vpop.f32.mrf.mxu0  ;;  %v663_v45 = vpack.c.bf16 %v2062_v42, %v2059_v41  ;;  %v2118_v46 = vpop.f32.mrf.mxu1 }
 0x182   : > { %v2064_v47 = vpop.f32.mrf.mxu0  ;;  %2208 = vmatmul.mubr.msk.bf16.vlgmr.msra.gmra.mxu1 %vm951_vm0, %v663_v45  ;;  %v2119_v48 = vpop.f32.mrf.mxu1 }
 0x183   : > { %v2120_v51 = vadd.f32 %v2119_v48, %v2118_v46  ;;  %v2065_v54 = vadd.f32 %v2064_v47, %v2063_v44 }
 0x184   : > { %v2066_v49 = vpop.f32.mrf.mxu0  ;;  %v2121_v52 = vpop.f32.mrf.mxu1 }
 0x185   : > { %v931_v55 = vpack.c.bf16 %v2120_v51, %v2117_v50 }
 0x186   : > { %v2067_v53 = vpop.f32.mrf.mxu0  ;;  %v2122_v57 = vpop.f32.mrf.mxu1 }
 0x187   : > { %v2068_v56 = vadd.f32 %v2067_v53, %v2066_v49  ;;  %2187 = vmatprep.mubr.msk.bf16.mxu0 %vm951_vm0, %v931_v55  ;;  %v2123_v63 = vadd.f32 %v2122_v57, %v2121_v52 }
 0x188   : > { %v2124_v60 = vpop.f32.mrf.mxu1 }
 0x189   : > { %v664_v58 = vpack.c.bf16 %v2068_v56, %v2065_v54 }
 0x18a   : > { %v2069_v59 = vpop.f32.mrf.mxu0  ;;  %v2125_v62 = vpop.f32.mrf.mxu1 }
 0x18b   : > { %2211 = vmatprep.mubr.msk.bf16.mxu1 %vm951_vm0, %v664_v58  ;;  %v2126_v0 = vadd.f32 %v2125_v62, %v2124_v60 }
 0x18c   : > { %v2070_v61 = vpop.f32.mrf.mxu0  ;;  %v2127_v3 = vpop.f32.mrf.mxu1 }
 0x18d   : > { %v932_v6 = vpack.c.bf16 %v2126_v0, %v2123_v63  ;;  %v2071_v8 = vadd.f32 %v2070_v61, %v2069_v59  ;;  %v2322_v0 = vld [vmem:[%s3414_s4 + $0x64] ss:$8 sps:$4 sm:$0xff]  }
 0x18e   : > { %v2072_v2 = vpop.f32.mrf.mxu0  ;;  %v2128_v9 = vpop.f32.mrf.mxu1 }
 0x18f   : > { %2188 = vmatmul.mubr.msk.bf16.vlgmr.msra.gmra.mxu0 %vm951_vm0, %v932_v6  ;;  %v2129_v29 = vadd.f32 %v2128_v9, %v2127_v3  ;;  %v2325_v3 = vld [vmem:[%s3414_s4 + $0x54] ss:$8 sps:$4 sm:$0xff]   ;;  %v2328_v6 = vld [vmem:[%s3414_s4 + $0x44] ss:$8 sps:$4 sm:$0xff]  }
 0x190   : > { %v2073_v7 = vpop.f32.mrf.mxu0  ;;  %v2130_v23 = vpop.f32.mrf.mxu1  ;;  %1362 = vmatpush1.bf16.msra.mxu0 %v2317_v4  ;;  %v2323_v4 = vld [vmem:[%s3414_s4 + $0x50] ss:$8 sps:$4 sm:$0xff]   ;;  %v2334_v9 = vld [vmem:[%s3414_s4 + $0x24] ss:$8 sps:$4 sm:$0xff]  }
 0x191   : > { %v2074_v10 = vadd.f32 %v2073_v7, %v2072_v2  ;;  %v2320_v2 = vld [vmem:[%s3414_s4 + $0x60] ss:$8 sps:$4 sm:$0xff]   ;;  %1363 = vmatprep.subr.bf16.mxu0 %v2322_v0  ;;  %v2331_v7 = vld [vmem:[%s3414_s4 + $0x34] ss:$8 sps:$4 sm:$0xff]  }
 0x192   : > { %v2131_v27 = vpop.f32.mrf.mxu1 }
 0x193   : > { %v665_v21 = vpack.c.bf16 %v2074_v10, %v2071_v8  ;;  %v2132_v30 = vadd.f32 %v2131_v27, %v2130_v23  ;;  %v2329_v8 = vld [vmem:[%s3414_s4 + $0x30] ss:$8 sps:$4 sm:$0xff]   ;;  %v2332_v10 = vld [vmem:[%s3414_s4 + $0x20] ss:$8 sps:$4 sm:$0xff]   ;;  %v2340_v23 = vld [vmem:[%s3414_s4 + $0x4] ss:$8 sps:$4 sm:$0xff]  }
 0x194   : > { %v2133_v15 = vpop.f32.mrf.mxu1  ;;  %1364 = vmatpush1.bf16.msra.mxu0 %v2320_v2 }
 0x195   : > { %2212 = vmatmul.mubr.msk.bf16.gmra.mxu1 %vm951_vm0, %v665_v21  ;;  %v933_v13 = vpack.c.bf16 %v2132_v30, %v2129_v29  ;;  %1365 = vmatprep.subr.bf16.mxu0 %v2325_v3  ;;  %v2335_v21 = vld [vmem:[%s3414_s4 + $0x10] ss:$8 sps:$4 sm:$0xff]  }
 0x196   : > { %2215 = vmatprep.mubr.msk.bf16.mxu1 %vm951_vm0, %v666_v25  ;;  %v2134_v33 = vpop.f32.mrf.mxu1  ;;  %v2338_v25 = vld [vmem:[%s3414_s4] ss:$8 sps:$4 sm:$0xff]  }
 0x197   : > { %2191 = vmatprep.mubr.msk.bf16.mxu0 %vm951_vm0, %v933_v13  ;;  %v2135_v18 = vadd.f32 %v2134_v33, %v2133_v15  ;;  %v3001_v33 = vld [vmem:[%s3413_s3] ss:$0 sm:$0xff] }
 0x198   : > { %v2136_v39 = vpop.f32.mrf.mxu1  ;;  %1366 = vmatpush1.bf16.msra.mxu0 %v2323_v4 }
 0x199   : > { %1367 = vmatprep.subr.bf16.mxu0 %v2328_v6 }
 0x19a   : > { %v2137_v41 = vpop.f32.mrf.mxu1 }
 0x19b   : > { %v2138_v19 = vadd.f32 %v2137_v41, %v2136_v39 }
 0x19c   : > { %v2139_v16 = vpop.f32.mrf.mxu1  ;;  %1368 = vmatpush1.bf16.msra.mxu0 %v2326_v5 }
 0x19d   : > { %2216 = vmatmul.mubr.msk.bf16.gmra.mxu1 %vm951_vm0, %v667_v37  ;;  %v934_v17 = vpack.c.bf16 %v2138_v19, %v2135_v18  ;;  %1369 = vmatprep.subr.bf16.mxu0 %v2331_v7 }
 0x19e   : > { %2219 = vmatprep.mubr.msk.bf16.mxu1 %vm951_vm0, %v668_v40  ;;  %v2140_v22 = vpop.f32.mrf.mxu1 }
 0x19f   : > { %2192 = vmatmul.mubr.msk.bf16.gmra.mxu0 %vm951_vm0, %v934_v17  ;;  %v2141_v44 = vadd.f32 %v2140_v22, %v2139_v16 }
 0x1a0   : > { %v2142_v42 = vpop.f32.mrf.mxu1  ;;  %1370 = vmatpush1.bf16.msra.mxu0 %v2329_v8 }
 0x1a1   : > { %1371 = vmatprep.subr.bf16.mxu0 %v2334_v9 }
 0x1a2   : > { %v2143_v43 = vpop.f32.mrf.mxu1 }
 0x1a3   : > { %v2144_v45 = vadd.f32 %v2143_v43, %v2142_v42 }
 0x1a4   : > { %v2145_v46 = vpop.f32.mrf.mxu1  ;;  %1372 = vmatpush1.bf16.msra.mxu0 %v2332_v10 }
 0x1a5   : > { %2220 = vmatmul.mubr.msk.bf16.gmra.mxu1 %vm951_vm0, %v669_v26  ;;  %v935_v47 = vpack.c.bf16 %v2144_v45, %v2141_v44  ;;  %1373 = vmatprep.subr.bf16.mxu0 %v2337_v11 }
 0x1a6   : > { %v2146_v48 = vpop.f32.mrf.mxu1 }
 0x1a7   : > { %2195 = vmatprep.mubr.msk.bf16.mxu0 %vm951_vm0, %v935_v47  ;;  %v2147_v49 = vadd.f32 %v2146_v48, %v2145_v46 }
 0x1a8   : > { %v2148_v36 = vpop.f32.mrf.mxu1  ;;  %1374 = vmatpush1.bf16.msra.mxu0 %v2335_v21 }
 0x1a9   : > { %1375 = vmatprep.subr.bf16.mxu0 %v2340_v23 }
 0x1aa   : > { %v2149_v38 = vpop.f32.mrf.mxu1 }
 0x1ab   : > { %v2150_v50 = vadd.f32 %v2149_v38, %v2148_v36 }
 0x1ac   : > { %v2151_v28 = vpop.f32.mrf.mxu1  ;;  %1376 = vmatpush1.bf16.msra.mxu0 %v2338_v25 }
 0x1ad   : > { %v936_v32 = vpack.c.bf16 %v2150_v50, %v2147_v49 }
 0x1ae   : > { %v2152_v51 = vpop.f32.mrf.mxu1 }
 0x1af   : > { %2196 = vmatmul.mubr.msk.bf16.gmra.mxu0 %vm951_vm0, %v936_v32  ;;  %v2153_v54 = vadd.f32 %v2152_v51, %v2151_v28 }
 0x1b0   : > { %v2154_v52 = vpop.f32.mrf.mxu1 }
 0x1b2   : > { %v2155_v53 = vpop.f32.mrf.mxu1 }
 0x1b3   : > { %v2156_v55 = vadd.f32 %v2155_v53, %v2154_v52 }
 0x1b4   : > { %v2157_v56 = vpop.f32.mrf.mxu1 }
 0x1b5   : > { %v937_v57 = vpack.c.bf16 %v2156_v55, %v2153_v54 }
 0x1b6   : > { %v2158_v58 = vpop.f32.mrf.mxu1 }
 0x1b7   : > { %2199 = vmatprep.mubr.msk.bf16.mxu0 %vm951_vm0, %v937_v57  ;;  %v2159_v61 = vadd.f32 %v2158_v58, %v2157_v56 }
 0x1b8   : > { %v2160_v59 = vpop.f32.mrf.mxu1 }
 0x1ba   : > { %v2161_v60 = vpop.f32.mrf.mxu1 }
 0x1bb   : > { %v2162_v62 = vadd.f32 %v2161_v60, %v2160_v59 }
 0x1bd   : > { %v938_v63 = vpack.c.bf16 %v2162_v62, %v2159_v61 }
 0x1bf   : > { %2200 = vmatmul.mubr.msk.bf16.gmra.mxu0 %vm951_vm0, %v938_v63 }
 0x1c0   : > { %1393 = vmatprep.mubr.bf16.mxu0 %v2499_v1 }
 0x242   : > { %v2209_v27 = vpop.f32.mrf.mxu1 }
 0x244   : > { %v1143_v29 = vpop.f32.mrf.mxu1 }
 0x246   : > { %v2210_v14 = vpop.f32.mrf.mxu1 }
 0x248   : > { %v1146_v31 = vpop.f32.mrf.mxu1 }
 0x24f   : > { %v2189_v30 = vpop.f32.mrf.mxu0 }
 0x250   : > { %v1152_v19 = vadd.f32 %v2209_v27, %v2189_v30 }
 0x251   : > { %v1010_v15 = vpop.f32.mrf.mxu0 }
 0x252   : > { %v1144_v12 = vadd.f32 %v1143_v29, %v1010_v15  ;;  %v1215_v26 = vadd.f32 %v3001_v33, %v1152_v19 }
 0x253   : > { %v2190_v13 = vpop.f32.mrf.mxu0 }
 0x254   : > { %v1213_v37 = vadd.f32 %v3001_v33, %v1144_v12  ;;  %v1155_v40 = vadd.f32 %v2210_v14, %v2190_v13  ;;  %v1231_v46 = vmax.f32 %v1215_v26, 0.0 }
 0x255   : > { %v1013_v35 = vpop.f32.mrf.mxu0  ;;  %v2213_v18 = vpop.f32.mrf.mxu1 }
 0x256   : > { %v1147_v39 = vadd.f32 %v1146_v31, %v1013_v35  ;;  %v1229_v24 = vmax.f32 %v1213_v37, 0.0  ;;  %v1216_v17 = vadd.f32 %v3001_v33, %v1155_v40 }
 0x257   : > { %v1159_v22 = vpop.f32.mrf.mxu1 }
 0x258   : > { %v1214_v41 = vadd.f32 %v3001_v33, %v1147_v39  ;;  %v1232_v43 = vmax.f32 %v1216_v17, 0.0 }
 0x259   : > { %v2214_v44 = vpop.f32.mrf.mxu1 }
 0x25a   : > { %v1230_v16 = vmax.f32 %v1214_v41, 0.0  ;;  %v1246_v36 = vpack.c.bf16 %v1232_v43, %v1231_v46 }
 0x25b   : > { %v1162_v38 = vpop.f32.mrf.mxu1 }
 0x25c   : > { %v1245_v20 = vpack.c.bf16 %v1230_v16, %v1229_v24 }
 0x25d   : > { %v2217_v52 = vpop.f32.mrf.mxu1 }
 0x25e   : > { %1394 = vmatmul.mubr.bf16.vlgmr.msra.gmra.mxu0 %v1245_v20 }
 0x25f   : > { %v2193_v42 = vpop.f32.mrf.mxu0  ;;  %1403 = vmatprep.mubr.bf16.mxu0 %v2499_v1  ;;  %v1175_v58 = vpop.f32.mrf.mxu1 }
 0x260   : > { %v1168_v53 = vadd.f32 %v2213_v18, %v2193_v42 }
 0x261   : > { %v1026_v45 = vpop.f32.mrf.mxu0  ;;  %v2218_v62 = vpop.f32.mrf.mxu1 }
 0x262   : > { %v1160_v47 = vadd.f32 %v1159_v22, %v1026_v45  ;;  %v1219_v59 = vadd.f32 %v3001_v33, %v1168_v53 }
 0x263   : > { %v2194_v48 = vpop.f32.mrf.mxu0  ;;  %v1178_v5 = vpop.f32.mrf.mxu1 }
 0x264   : > { %v1217_v50 = vadd.f32 %v3001_v33, %v1160_v47  ;;  %v1171_v32 = vadd.f32 %v2214_v44, %v2194_v48  ;;  %v1235_v0 = vmax.f32 %v1219_v59, 0.0  ;;  %v1272_v48 = vshrl.u32 %v270_v34, 7 }
 0x265   : > { %v1029_v49 = vpop.f32.mrf.mxu0  ;;  %v2221_v11 = vpop.f32.mrf.mxu1 }
 0x266   : > { %v1163_v28 = vadd.f32 %v1162_v38, %v1029_v49  ;;  %1404 = vmatmul.mubr.bf16.gmra.mxu0 %v1246_v36  ;;  %v1233_v54 = vmax.f32 %v1217_v50, 0.0  ;;  %v1220_v56 = vadd.f32 %v3001_v33, %v1171_v32  ;;  %v1273_v36 = vsub.s32 0, %v1272_v48  ;;  %v1269_v49 = vld [vmem:[%s3415_s5] sm:$0x3] }
 0x267   : > { %1413 = vmatprep.mubr.bf16.mxu0 %v2499_v1  ;;  %v1191_v30 = vpop.f32.mrf.mxu1  ;;  %v1277_v38 = vsub.s32 1, %v1272_v48 }
 0x268   : > { %v1218_v51 = vadd.f32 %v3001_v33, %v1163_v28  ;;  %v1236_v61 = vmax.f32 %v1220_v56, 0.0  ;;  %v3030_v50 = vrot.slane %v1269_v49, %v1273_v36 }
 0x269   : > { %v2222_v13 = vpop.f32.mrf.mxu1  ;;  %v3032_v28 = vrot.slane %v1269_v49, %v1277_v38 }
 0x26a   : > { %v1234_v55 = vmax.f32 %v1218_v51, 0.0  ;;  %v1248_v4 = vpack.c.bf16 %v1236_v61, %v1235_v0 }
 0x26b   : > { %v1194_v41 = vpop.f32.mrf.mxu1 }
 0x26c   : > { %v1247_v57 = vpack.c.bf16 %v1234_v55, %v1233_v54 }
 0x26e   : > { %1414 = vmatmul.mubr.bf16.gmra.mxu0 %v1247_v57 }
 0x26f   : > { %v2197_v60 = vpop.f32.mrf.mxu0  ;;  %1423 = vmatprep.mubr.bf16.mxu0 %v2499_v1 }
 0x270   : > { %v1184_v21 = vadd.f32 %v2217_v52, %v2197_v60 }
 0x271   : > { %v1042_v63 = vpop.f32.mrf.mxu0 }
 0x272   : > { %v1176_v2 = vadd.f32 %v1175_v58, %v1042_v63  ;;  %v1223_v14 = vadd.f32 %v3001_v33, %v1184_v21 }
 0x273   : > { %v2198_v3 = vpop.f32.mrf.mxu0 }
 0x274   : > { %v1221_v7 = vadd.f32 %v3001_v33, %v1176_v2  ;;  %v1187_v9 = vadd.f32 %v2218_v62, %v2198_v3  ;;  %v1239_v35 = vmax.f32 %v1223_v14, 0.0 }
 0x275   : > { %v1045_v6 = vpop.f32.mrf.mxu0 }
 0x276   : > { %v1179_v8 = vadd.f32 %v1178_v5, %v1045_v6  ;;  %1424 = vmatmul.mubr.bf16.gmra.mxu0 %v1248_v4  ;;  %v1237_v23 = vmax.f32 %v1221_v7, 0.0  ;;  %v1224_v27 = vadd.f32 %v3001_v33, %v1187_v9 }
 0x277   : > { %1433 = vmatprep.mubr.bf16.mxu0 %v2499_v1 }
 0x278   : > { %v1222_v10 = vadd.f32 %v3001_v33, %v1179_v8  ;;  %v1240_v12 = vmax.f32 %v1224_v27, 0.0 }
 0x27a   : > { %v1238_v25 = vmax.f32 %v1222_v10, 0.0  ;;  %v1250_v40 = vpack.c.bf16 %v1240_v12, %v1239_v35 }
 0x27c   : > { %v1249_v29 = vpack.c.bf16 %v1238_v25, %v1237_v23 }
 0x27e   : > { %1434 = vmatmul.mubr.bf16.gmra.mxu0 %v1249_v29 }
 0x27f   : > { %v2201_v15 = vpop.f32.mrf.mxu0  ;;  %1443 = vmatprep.mubr.bf16.mxu0 %v2499_v1 }
 0x280   : > { %v1200_v20 = vadd.f32 %v2221_v11, %v2201_v15 }
 0x281   : > { %v1058_v31 = vpop.f32.mrf.mxu0 }
 0x282   : > { %v1192_v37 = vadd.f32 %v1191_v30, %v1058_v31  ;;  %v1227_v44 = vadd.f32 %v3001_v33, %v1200_v20 }
 0x283   : > { %v2202_v39 = vpop.f32.mrf.mxu0 }
 0x284   : > { %v1225_v19 = vadd.f32 %v3001_v33, %v1192_v37  ;;  %v1203_v16 = vadd.f32 %v2222_v13, %v2202_v39  ;;  %v1243_v46 = vmax.f32 %v1227_v44, 0.0 }
 0x285   : > { %v1061_v18 = vpop.f32.mrf.mxu0 }
 0x286   : > { %v1195_v24 = vadd.f32 %v1194_v41, %v1061_v18  ;;  %1444 = vmatmul.mubr.bf16.gmra.mxu0 %v1250_v40  ;;  %v1241_v22 = vmax.f32 %v1225_v19, 0.0  ;;  %v1228_v42 = vadd.f32 %v3001_v33, %v1203_v16 }
 0x287   : > { %1453 = vmatprep.mubr.bf16.mxu0 %v2499_v1 }
 0x288   : > { %v1226_v17 = vadd.f32 %v3001_v33, %v1195_v24  ;;  %v1244_v45 = vmax.f32 %v1228_v42, 0.0 }
 0x28a   : > { %v1242_v26 = vmax.f32 %v1226_v17, 0.0  ;;  %v1252_v47 = vpack.c.bf16 %v1244_v45, %v1243_v46 }
 0x28c   : > { %v1251_v43 = vpack.c.bf16 %v1242_v26, %v1241_v22 }
 0x28e   : > { %1454 = vmatmul.mubr.bf16.gmra.mxu0 %v1251_v43 }
 0x28f   : > { %1463 = vmatprep.mubr.bf16.mxu0 %v2499_v1 }
 0x296   : > { %1464 = vmatmul.mubr.bf16.gmra.mxu0 %v1252_v47 }
 0x31e   : > { %v1395_v33 = vpop.f32.mrf.mxu0 }
 0x31f   : > { %v3035_v1 = vadd.f32 %v1395_v33, %v3030_v50 }
 0x320   : > { %v1397_v32 = vpop.f32.mrf.mxu0 }
 0x321   : > { %v3038_v51 = vadd.f32 %v1397_v32, %v3032_v28 }
 0x322   : > { %v1399_v52 = vpop.f32.mrf.mxu0 }
 0x323   : > { %v1474_v34 = vmax.f32 %v3035_v1, %v3038_v51  ;;  %v3043_v54 = vadd.f32 %v1399_v52, %v3030_v50 }
 0x324   : > { %v1401_v53 = vpop.f32.mrf.mxu0 }
 0x325   : > { %v3046_v55 = vadd.f32 %v1401_v53, %v3032_v28  ;;  %1475 = vmax.xlane.f32.xlu1 %v1474_v34 }
 0x326   : > { %v1405_v56 = vpop.f32.mrf.mxu0 }
 0x327   : > { %v1477_v57 = vmax.f32 %v3043_v54, %v3046_v55  ;;  %v3051_v59 = vadd.f32 %v1405_v56, %v3030_v50 }
 0x328   : > { %v1407_v58 = vpop.f32.mrf.mxu0 }
 0x329   : > { %v3054_v60 = vadd.f32 %v1407_v58, %v3032_v28  ;;  %1478 = vmax.xlane.f32.xlu0 %v1477_v57 }
 0x32a   : > { %v1409_v61 = vpop.f32.mrf.mxu0 }
 0x32b   : > { %v1480_v62 = vmax.f32 %v3051_v59, %v3054_v60  ;;  %v3059_v0 = vadd.f32 %v1409_v61, %v3030_v50 }
 0x32c   : > { %v1411_v63 = vpop.f32.mrf.mxu0 }
 0x32d   : > { %v3062_v2 = vadd.f32 %v1411_v63, %v3032_v28  ;;  %1481 = vmax.xlane.f32.xlu0 %v1480_v62 }
 0x32e   : > { %v1415_v3 = vpop.f32.mrf.mxu0 }
 0x32f   : > { %v1483_v4 = vmax.f32 %v3059_v0, %v3062_v2  ;;  %v3067_v6 = vadd.f32 %v1415_v3, %v3030_v50 }
 0x330   : > { %v1417_v5 = vpop.f32.mrf.mxu0 }
 0x331   : > { %v3070_v7 = vadd.f32 %v1417_v5, %v3032_v28  ;;  %1484 = vmax.xlane.f32.xlu1 %v1483_v4 }
 0x332   : > { %v1419_v8 = vpop.f32.mrf.mxu0 }
 0x333   : > { %v1486_v9 = vmax.f32 %v3067_v6, %v3070_v7  ;;  %v3075_v11 = vadd.f32 %v1419_v8, %v3030_v50 }
 0x334   : > { %v1421_v10 = vpop.f32.mrf.mxu0 }
 0x335   : > { %v3078_v21 = vadd.f32 %v1421_v10, %v3032_v28  ;;  %1487 = vmax.xlane.f32.xlu0 %v1486_v9 }
 0x336   : > { %v1425_v23 = vpop.f32.mrf.mxu0 }
 0x337   : > { %v1489_v25 = vmax.f32 %v3075_v11, %v3078_v21  ;;  %v3083_v29 = vadd.f32 %v1425_v23, %v3030_v50 }
 0x338   : > { %v1427_v27 = vpop.f32.mrf.mxu0 }
 0x339   : > { %v3086_v30 = vadd.f32 %v1427_v27, %v3032_v28  ;;  %1490 = vmax.xlane.f32.xlu1 %v1489_v25 }
 0x33a   : > { %v1429_v14 = vpop.f32.mrf.mxu0 }
 0x33b   : > { %v1492_v15 = vmax.f32 %v3083_v29, %v3086_v30  ;;  %v3091_v13 = vadd.f32 %v1429_v14, %v3030_v50 }
 0x33c   : > { %v1431_v12 = vpop.f32.mrf.mxu0 }
 0x33d   : > { %v3094_v31 = vadd.f32 %v1431_v12, %v3032_v28  ;;  %1493 = vmax.xlane.f32.xlu0 %v1492_v15 }
 0x33e   : > { %v1435_v35 = vpop.f32.mrf.mxu0 }
 0x33f   : > { %v1495_v37 = vmax.f32 %v3091_v13, %v3094_v31  ;;  %v3099_v40 = vadd.f32 %v1435_v35, %v3030_v50 }
 0x340   : > { %v1437_v39 = vpop.f32.mrf.mxu0 }
 0x341   : > { %v3102_v41 = vadd.f32 %v1437_v39, %v3032_v28  ;;  %1496 = vmax.xlane.f32.xlu1 %v1495_v37 }
 0x342   : > { %v1439_v18 = vpop.f32.mrf.mxu0 }
 0x343   : > { %v1498_v19 = vmax.f32 %v3099_v40, %v3102_v41  ;;  %v3107_v16 = vadd.f32 %v1439_v18, %v3030_v50 }
 0x344   : > { %v1441_v24 = vpop.f32.mrf.mxu0 }
 0x345   : > { %v3110_v17 = vadd.f32 %v1441_v24, %v3032_v28  ;;  %1499 = vmax.xlane.f32.xlu0 %v1498_v19 }
 0x346   : > { %v1445_v20 = vpop.f32.mrf.mxu0 }
 0x347   : > { %v1501_v22 = vmax.f32 %v3107_v16, %v3110_v17  ;;  %v3115_v42 = vadd.f32 %v1445_v20, %v3030_v50 }
 0x348   : > { %v1447_v26 = vpop.f32.mrf.mxu0 }
 0x349   : > { %v3118_v43 = vadd.f32 %v1447_v26, %v3032_v28  ;;  %1502 = vmax.xlane.f32.xlu1 %v1501_v22 }
 0x34a   : > { %v1449_v44 = vpop.f32.mrf.mxu0 }
 0x34b   : > { %v1504_v45 = vmax.f32 %v3115_v42, %v3118_v43  ;;  %v3123_v47 = vadd.f32 %v1449_v44, %v3030_v50 }
 0x34c   : > { %v1451_v46 = vpop.f32.mrf.mxu0 }
 0x34d   : > { %v3126_v48 = vadd.f32 %v1451_v46, %v3032_v28  ;;  %1505 = vmax.xlane.f32.xlu0 %v1504_v45 }
 0x34e   : > { %v1455_v36 = vpop.f32.mrf.mxu0 }
 0x34f   : > { %v1507_v38 = vmax.f32 %v3123_v47, %v3126_v48  ;;  %v3131_v33 = vadd.f32 %v1455_v36, %v3030_v50 }
 0x350   : > { %v1457_v49 = vpop.f32.mrf.mxu0 }
 0x351   : > { %v3134_v32 = vadd.f32 %v1457_v49, %v3032_v28  ;;  %1508 = vmax.xlane.f32.xlu1 %v1507_v38 }
 0x352   : > { %v1459_v52 = vpop.f32.mrf.mxu0 }
 0x353   : > { %v1510_v34 = vmax.f32 %v3131_v33, %v3134_v32  ;;  %v3139_v56 = vadd.f32 %v1459_v52, %v3030_v50 }
 0x354   : > { %v1461_v53 = vpop.f32.mrf.mxu0 }
 0x355   : > { %v3142_v57 = vadd.f32 %v1461_v53, %v3032_v28  ;;  %1511 = vmax.xlane.f32.xlu0 %v1510_v34 }
 0x356   : > { %v1465_v58 = vpop.f32.mrf.mxu0 }
 0x357   : > { %v1513_v61 = vmax.f32 %v3139_v56, %v3142_v57  ;;  %v3147_v63 = vadd.f32 %v1465_v58, %v3030_v50 }
 0x358   : > { %v1467_v62 = vpop.f32.mrf.mxu0 }
 0x359   : > { %v3150_v3 = vadd.f32 %v1467_v62, %v3032_v28  ;;  %1514 = vmax.xlane.f32.xlu1 %v1513_v61 }
 0x35a   : > { %v1469_v4 = vpop.f32.mrf.mxu0 }
 0x35b   : > { %v1516_v5 = vmax.f32 %v3147_v63, %v3150_v3  ;;  %v3155_v9 = vadd.f32 %v1469_v4, %v3030_v50 }
 0x35c   : > { %v1471_v8 = vpop.f32.mrf.mxu0 }
 0x35d   : > { %v3158_v10 = vadd.f32 %v1471_v8, %v3032_v28  ;;  %1517 = vmax.xlane.f32.xlu0 %v1516_v5 }
 0x35f   : > { %v1519_v23 = vmax.f32 %v3155_v9, %v3158_v10 }
 0x361   : > { %1520 = vmax.xlane.f32.xlu1 %v1519_v23 }
 0x3ae   : > { %v1476_v25 = vpop.xlane.xlu1 %1475 }
 0x3af   : > { %v3163_v27 = vsub.f32 %v3035_v1, %v1476_v25  ;;  %v3166_v14 = vsub.f32 %v3038_v51, %v1476_v25 }
 0x3b1   : > { %v1554_v15 = vmul.f32 1.442695, %v3163_v27  ;;  %v1556_v50 = vmul.f32 1.442695, %v3166_v14 }
 0x3b2   : > { %v1479_v12 = vpop.xlane.xlu0 %1478 }
 0x3b3   : > { %2341 = vpow2.f32 %v1554_v15  ;;  %v3171_v28 = vsub.f32 %v3043_v54, %v1479_v12  ;;  %v3174_v35 = vsub.f32 %v3046_v55, %v1479_v12 }
 0x3b4   : > { %2343 = vpow2.f32 %v1556_v50 }
 0x3b5   : > { %v1558_v37 = vmul.f32 1.442695, %v3171_v28  ;;  %v1560_v1 = vmul.f32 1.442695, %v3174_v35 }
 0x3b6   : > { %v1482_v39 = vpop.xlane.xlu0 %1481 }
 0x3b7   : > { %2345 = vpow2.f32 %v1558_v37  ;;  %v3179_v51 = vsub.f32 %v3051_v59, %v1482_v39  ;;  %v3182_v18 = vsub.f32 %v3054_v60, %v1482_v39 }
 0x3b8   : > { %2347 = vpow2.f32 %v1560_v1 }
 0x3b9   : > { %v1562_v54 = vmul.f32 1.442695, %v3179_v51  ;;  %v1564_v19 = vmul.f32 1.442695, %v3182_v18 }
 0x3ba   : > { %v1485_v55 = vpop.xlane.xlu1 %1484 }
 0x3bb   : > { %2349 = vpow2.f32 %v1562_v54  ;;  %v3187_v24 = vsub.f32 %v3059_v0, %v1485_v55  ;;  %v3190_v20 = vsub.f32 %v3062_v2, %v1485_v55 }
 0x3bc   : > { %2351 = vpow2.f32 %v1564_v19 }
 0x3bd   : > { %v1566_v59 = vmul.f32 1.442695, %v3187_v24  ;;  %v1568_v22 = vmul.f32 1.442695, %v3190_v20 }
 0x3be   : > { %v1488_v60 = vpop.xlane.xlu0 %1487 }
 0x3bf   : > { %2353 = vpow2.f32 %v1566_v59  ;;  %v3195_v26 = vsub.f32 %v3067_v6, %v1488_v60  ;;  %v3198_v44 = vsub.f32 %v3070_v7, %v1488_v60 }
 0x3c0   : > { %v2342_v45 = vpop.eup %2341  ;;  %2355 = vpow2.f32 %v1568_v22 }
 0x3c1   : > { %v2344_v0 = vpop.eup %2343  ;;  %v1570_v46 = vmul.f32 1.442695, %v3195_v26  ;;  %v1572_v2 = vmul.f32 1.442695, %v3198_v44 }
 0x3c2   : > { %v1491_v36 = vpop.xlane.xlu1 %1490  ;;  %v1618_v38 = vadd.f32 %v2344_v0, %v2342_v45 }
 0x3c3   : > { %2357 = vpow2.f32 %v1570_v46  ;;  %v3203_v49 = vsub.f32 %v3075_v11, %v1491_v36  ;;  %v3206_v52 = vsub.f32 %v3078_v21, %v1491_v36 }
 0x3c4   : > { %v2346_v6 = vpop.eup %2345  ;;  %2359 = vpow2.f32 %v1572_v2  ;;  %1619 = vadd.xlane.f32.xlu0 %v1618_v38 }
 0x3c5   : > { %v2348_v7 = vpop.eup %2347  ;;  %v1574_v34 = vmul.f32 1.442695, %v3203_v49  ;;  %v1576_v53 = vmul.f32 1.442695, %v3206_v52 }
 0x3c6   : > { %v1494_v58 = vpop.xlane.xlu0 %1493  ;;  %v1621_v61 = vadd.f32 %v2348_v7, %v2346_v6 }
 0x3c7   : > { %2361 = vpow2.f32 %v1574_v34  ;;  %v3211_v62 = vsub.f32 %v3083_v29, %v1494_v58  ;;  %v3214_v11 = vsub.f32 %v3086_v30, %v1494_v58 }
 0x3c8   : > { %v2350_v4 = vpop.eup %2349  ;;  %2363 = vpow2.f32 %v1576_v53  ;;  %1622 = vadd.xlane.f32.xlu1 %v1621_v61 }
 0x3c9   : > { %v2352_v21 = vpop.eup %2351  ;;  %v1578_v5 = vmul.f32 1.442695, %v3211_v62  ;;  %v1580_v8 = vmul.f32 1.442695, %v3214_v11 }
 0x3ca   : > { %v1497_v23 = vpop.xlane.xlu1 %1496  ;;  %v1624_v25 = vadd.f32 %v2352_v21, %v2350_v4 }
 0x3cb   : > { %2365 = vpow2.f32 %v1578_v5  ;;  %v3219_v15 = vsub.f32 %v3091_v13, %v1497_v23  ;;  %v3222_v29 = vsub.f32 %v3094_v31, %v1497_v23 }
 0x3cc   : > { %v2354_v50 = vpop.eup %2353  ;;  %2367 = vpow2.f32 %v1580_v8  ;;  %1625 = vadd.xlane.f32.xlu0 %v1624_v25 }
 0x3cd   : > { %v2356_v30 = vpop.eup %2355  ;;  %v1582_v12 = vmul.f32 1.442695, %v3219_v15  ;;  %v1584_v37 = vmul.f32 1.442695, %v3222_v29 }
 0x3ce   : > { %v1500_v1 = vpop.xlane.xlu0 %1499  ;;  %v1627_v39 = vadd.f32 %v2356_v30, %v2354_v50 }
 0x3cf   : > { %2369 = vpow2.f32 %v1582_v12  ;;  %v3227_v54 = vsub.f32 %v3099_v40, %v1500_v1  ;;  %v3230_v13 = vsub.f32 %v3102_v41, %v1500_v1 }
 0x3d0   : > { %v2358_v19 = vpop.eup %2357  ;;  %2371 = vpow2.f32 %v1584_v37  ;;  %1628 = vadd.xlane.f32.xlu1 %v1627_v39 }
 0x3d1   : > { %v2360_v31 = vpop.eup %2359  ;;  %v1586_v55 = vmul.f32 1.442695, %v3227_v54  ;;  %v1588_v59 = vmul.f32 1.442695, %v3230_v13 }
 0x3d2   : > { %v1503_v22 = vpop.xlane.xlu1 %1502  ;;  %v1630_v60 = vadd.f32 %v2360_v31, %v2358_v19 }
 0x3d3   : > { %2373 = vpow2.f32 %v1586_v55  ;;  %v3235_v45 = vsub.f32 %v3107_v16, %v1503_v22  ;;  %v3238_v40 = vsub.f32 %v3110_v17, %v1503_v22 }
 0x3d4   : > { %v2362_v0 = vpop.eup %2361  ;;  %2375 = vpow2.f32 %v1588_v59  ;;  %1631 = vadd.xlane.f32.xlu0 %v1630_v60 }
 0x3d5   : > { %v2364_v41 = vpop.eup %2363  ;;  %v1590_v46 = vmul.f32 1.442695, %v3235_v45  ;;  %v1592_v2 = vmul.f32 1.442695, %v3238_v40 }
 0x3d6   : > { %v1506_v36 = vpop.xlane.xlu0 %1505  ;;  %v1633_v38 = vadd.f32 %v2364_v41, %v2362_v0 }
 0x3d7   : > { %2377 = vpow2.f32 %v1590_v46  ;;  %v3243_v6 = vsub.f32 %v3115_v42, %v1506_v36  ;;  %v3246_v16 = vsub.f32 %v3118_v43, %v1506_v36 }
 0x3d8   : > { %v2366_v7 = vpop.eup %2365  ;;  %2379 = vpow2.f32 %v1592_v2  ;;  %1634 = vadd.xlane.f32.xlu1 %v1633_v38 }
 0x3d9   : > { %v2368_v17 = vpop.eup %2367  ;;  %v1594_v34 = vmul.f32 1.442695, %v3243_v6  ;;  %v1596_v53 = vmul.f32 1.442695, %v3246_v16 }
 0x3da   : > { %v1509_v58 = vpop.xlane.xlu1 %1508  ;;  %v1636_v61 = vadd.f32 %v2368_v17, %v2366_v7 }
 0x3db   : > { %2381 = vpow2.f32 %v1594_v34  ;;  %v3251_v4 = vsub.f32 %v3123_v47, %v1509_v58  ;;  %v3254_v42 = vsub.f32 %v3126_v48, %v1509_v58 }
 0x3dc   : > { %v2370_v21 = vpop.eup %2369  ;;  %2383 = vpow2.f32 %v1596_v53  ;;  %1637 = vadd.xlane.f32.xlu0 %v1636_v61 }
 0x3dd   : > { %v2372_v43 = vpop.eup %2371  ;;  %v1598_v5 = vmul.f32 1.442695, %v3251_v4  ;;  %v1600_v8 = vmul.f32 1.442695, %v3254_v42 }
 0x3de   : > { %v1512_v23 = vpop.xlane.xlu0 %1511  ;;  %v1639_v25 = vadd.f32 %v2372_v43, %v2370_v21 }
 0x3df   : > { %2385 = vpow2.f32 %v1598_v5  ;;  %v3259_v50 = vsub.f32 %v3131_v33, %v1512_v23  ;;  %v3262_v47 = vsub.f32 %v3134_v32, %v1512_v23 }
 0x3e0   : > { %v2374_v30 = vpop.eup %2373  ;;  %2387 = vpow2.f32 %v1600_v8  ;;  %1640 = vadd.xlane.f32.xlu1 %v1639_v25 }
 0x3e1   : > { %v2376_v48 = vpop.eup %2375  ;;  %v1602_v12 = vmul.f32 1.442695, %v3259_v50  ;;  %v1604_v37 = vmul.f32 1.442695, %v3262_v47 }
 0x3e2   : > { %v1515_v1 = vpop.xlane.xlu1 %1514  ;;  %v1642_v39 = vadd.f32 %v2376_v48, %v2374_v30 }
 0x3e3   : > { %2389 = vpow2.f32 %v1602_v12  ;;  %v3267_v19 = vsub.f32 %v3139_v56, %v1515_v1  ;;  %v3270_v33 = vsub.f32 %v3142_v57, %v1515_v1 }
 0x3e4   : > { %v2378_v31 = vpop.eup %2377  ;;  %2391 = vpow2.f32 %v1604_v37  ;;  %1643 = vadd.xlane.f32.xlu0 %v1642_v39 }
 0x3e5   : > { %v2380_v32 = vpop.eup %2379  ;;  %v1606_v55 = vmul.f32 1.442695, %v3267_v19  ;;  %v1608_v59 = vmul.f32 1.442695, %v3270_v33 }
 0x3e6   : > { %v1518_v22 = vpop.xlane.xlu0 %1517  ;;  %v1645_v60 = vadd.f32 %v2380_v32, %v2378_v31 }
 0x3e7   : > { %2393 = vpow2.f32 %v1606_v55  ;;  %v3275_v0 = vsub.f32 %v3147_v63, %v1518_v22  ;;  %v3278_v56 = vsub.f32 %v3150_v3, %v1518_v22 }
 0x3e8   : > { %v2382_v41 = vpop.eup %2381  ;;  %2395 = vpow2.f32 %v1608_v59  ;;  %1646 = vadd.xlane.f32.xlu1 %v1645_v60 }
 0x3e9   : > { %v2384_v57 = vpop.eup %2383  ;;  %v1610_v46 = vmul.f32 1.442695, %v3275_v0  ;;  %v1612_v2 = vmul.f32 1.442695, %v3278_v56 }
 0x3ea   : > { %v1521_v36 = vpop.xlane.xlu1 %1520  ;;  %v1648_v38 = vadd.f32 %v2384_v57, %v2382_v41 }
 0x3eb   : > { %2397 = vpow2.f32 %v1610_v46  ;;  %v3283_v7 = vsub.f32 %v3155_v9, %v1521_v36  ;;  %v3286_v63 = vsub.f32 %v3158_v10, %v1521_v36 }
 0x3ec   : > { %v2386_v17 = vpop.eup %2385  ;;  %2399 = vpow2.f32 %v1612_v2  ;;  %1649 = vadd.xlane.f32.xlu0 %v1648_v38 }
 0x3ed   : > { %v2388_v3 = vpop.eup %2387  ;;  %v1614_v34 = vmul.f32 1.442695, %v3283_v7  ;;  %v1616_v53 = vmul.f32 1.442695, %v3286_v63 }
 0x3ee   : > { %v1651_v58 = vadd.f32 %v2388_v3, %v2386_v17 }
 0x3ef   : > { %2401 = vpow2.f32 %v1614_v34 }
 0x3f0   : > { %v2390_v61 = vpop.eup %2389  ;;  %2403 = vpow2.f32 %v1616_v53  ;;  %1652 = vadd.xlane.f32.xlu1 %v1651_v58 }
 0x3f1   : > { %v2392_v21 = vpop.eup %2391 }
 0x3f2   : > { %v1654_v43 = vadd.f32 %v2392_v21, %v2390_v61 }
 0x3f4   : > { %v2394_v9 = vpop.eup %2393  ;;  %1655 = vadd.xlane.f32.xlu0 %v1654_v43 }
 0x3f5   : > { %v2396_v5 = vpop.eup %2395 }
 0x3f6   : > { %v1657_v10 = vadd.f32 %v2396_v5, %v2394_v9 }
 0x3f8   : > { %v2398_v8 = vpop.eup %2397  ;;  %1658 = vadd.xlane.f32.xlu1 %v1657_v10 }
 0x3f9   : > { %v2400_v23 = vpop.eup %2399 }
 0x3fa   : > { %v1660_v25 = vadd.f32 %v2400_v23, %v2398_v8 }
 0x3fc   : > { %v2402_v30 = vpop.eup %2401  ;;  %1661 = vadd.xlane.f32.xlu0 %v1660_v25 }
 0x3fd   : > { %v2404_v48 = vpop.eup %2403 }
 0x3fe   : > { %v1663_v12 = vadd.f32 %v2404_v48, %v2402_v30 }
 0x400   : > { %1664 = vadd.xlane.f32.xlu1 %v1663_v12 }
 0x44d   : > { %v1620_v37 = vpop.xlane.xlu0 %1619 }
 0x44e   : > { %2405 = vlog2.f32 %v1620_v37 }
 0x451   : > { %v1623_v1 = vpop.xlane.xlu1 %1622 }
 0x452   : > { %2407 = vlog2.f32 %v1623_v1 }
 0x455   : > { %v1626_v39 = vpop.xlane.xlu0 %1625 }
 0x456   : > { %2409 = vlog2.f32 %v1626_v39 }
 0x459   : > { %v1629_v31 = vpop.xlane.xlu1 %1628 }
 0x45a   : > { %2411 = vlog2.f32 %v1629_v31 }
 0x45b   : > { %v2406_v32 = vpop.eup %2405 }
 0x45c   : > { %v1667_v55 = vmul.f32 0.6931472, %v2406_v32 }
 0x45d   : > { %v1632_v59 = vpop.xlane.xlu0 %1631 }
 0x45e   : > { %v1698_v22 = vsub.f32 %v3163_v27, %v1667_v55  ;;  %v1699_v60 = vsub.f32 %v3166_v14, %v1667_v55  ;;  %2413 = vlog2.f32 %v1632_v59 }
 0x45f   : > { %v2408_v41 = vpop.eup %2407 }
 0x460   : > { %1730 = vst [vmem:[%s3295_s17] sm:$0xff] %v1698_v22  ;;  %1731 = vst [vmem:[%s3295_s17 + $0x8] sm:$0xff] %v1699_v60  ;;  %v1669_v57 = vmul.f32 0.6931472, %v2408_v41 }
 0x461   : > { %v1635_v46 = vpop.xlane.xlu1 %1634 }
 0x462   : > { %v1700_v2 = vsub.f32 %v3171_v28, %v1669_v57  ;;  %v1701_v27 = vsub.f32 %v3174_v35, %v1669_v57  ;;  %2415 = vlog2.f32 %v1635_v46 }
 0x463   : > { %v2410_v14 = vpop.eup %2409 }
 0x464   : > { %1732 = vst [vmem:[%s3295_s17 + $0x10] sm:$0xff] %v1700_v2  ;;  %1733 = vst [vmem:[%s3295_s17 + $0x18] sm:$0xff] %v1701_v27  ;;  %v1671_v36 = vmul.f32 0.6931472, %v2410_v14 }
 0x465   : > { %v1638_v38 = vpop.xlane.xlu0 %1637 }
 0x466   : > { %v1702_v17 = vsub.f32 %v3179_v51, %v1671_v36  ;;  %v1703_v3 = vsub.f32 %v3182_v18, %v1671_v36  ;;  %2417 = vlog2.f32 %v1638_v38 }
 0x467   : > { %v2412_v34 = vpop.eup %2411 }
 0x468   : > { %1734 = vst [vmem:[%s3295_s17 + $0x20] sm:$0xff] %v1702_v17  ;;  %1735 = vst [vmem:[%s3295_s17 + $0x28] sm:$0xff] %v1703_v3  ;;  %v1673_v28 = vmul.f32 0.6931472, %v2412_v34 }
 0x469   : > { %v1641_v35 = vpop.xlane.xlu1 %1640 }
 0x46a   : > { %v1704_v53 = vsub.f32 %v3187_v24, %v1673_v28  ;;  %v1705_v58 = vsub.f32 %v3190_v20, %v1673_v28  ;;  %2419 = vlog2.f32 %v1641_v35 }
 0x46b   : > { %v2414_v61 = vpop.eup %2413 }
 0x46c   : > { %1736 = vst [vmem:[%s3295_s17 + $0x30] sm:$0xff] %v1704_v53  ;;  %1737 = vst [vmem:[%s3295_s17 + $0x38] sm:$0xff] %v1705_v58  ;;  %v1675_v51 = vmul.f32 0.6931472, %v2414_v61 }
 0x46d   : > { %v1644_v18 = vpop.xlane.xlu0 %1643 }
 0x46e   : > { %v1706_v21 = vsub.f32 %v3195_v26, %v1675_v51  ;;  %v1707_v43 = vsub.f32 %v3198_v44, %v1675_v51  ;;  %2421 = vlog2.f32 %v1644_v18 }
 0x46f   : > { %v2416_v9 = vpop.eup %2415 }
 0x470   : > { %1738 = vst [vmem:[%s3295_s17 + $0x40] sm:$0xff] %v1706_v21  ;;  %1739 = vst [vmem:[%s3295_s17 + $0x48] sm:$0xff] %v1707_v43  ;;  %v1677_v24 = vmul.f32 0.6931472, %v2416_v9 }
 0x471   : > { %v1647_v20 = vpop.xlane.xlu1 %1646 }
 0x472   : > { %v1708_v5 = vsub.f32 %v3203_v49, %v1677_v24  ;;  %v1709_v10 = vsub.f32 %v3206_v52, %v1677_v24  ;;  %2423 = vlog2.f32 %v1647_v20 }
 0x473   : > { %v2418_v8 = vpop.eup %2417 }
 0x474   : > { %1740 = vst [vmem:[%s3295_s17 + $0x50] sm:$0xff] %v1708_v5  ;;  %1741 = vst [vmem:[%s3295_s17 + $0x58] sm:$0xff] %v1709_v10  ;;  %v1679_v26 = vmul.f32 0.6931472, %v2418_v8 }
 0x475   : > { %v1650_v44 = vpop.xlane.xlu0 %1649 }
 0x476   : > { %v1710_v23 = vsub.f32 %v3211_v62, %v1679_v26  ;;  %v1711_v25 = vsub.f32 %v3214_v11, %v1679_v26  ;;  %2425 = vlog2.f32 %v1650_v44 }
 0x477   : > { %v2420_v30 = vpop.eup %2419 }
 0x478   : > { %1742 = vst [vmem:[%s3295_s17 + $0x60] sm:$0xff] %v1710_v23  ;;  %1743 = vst [vmem:[%s3295_s17 + $0x68] sm:$0xff] %v1711_v25  ;;  %v1681_v49 = vmul.f32 0.6931472, %v2420_v30 }
 0x479   : > { %v1653_v52 = vpop.xlane.xlu1 %1652 }
 0x47a   : > { %v1712_v48 = vsub.f32 %v3219_v15, %v1681_v49  ;;  %v1713_v12 = vsub.f32 %v3222_v29, %v1681_v49  ;;  %2427 = vlog2.f32 %v1653_v52 }
 0x47b   : > { %v2422_v37 = vpop.eup %2421 }
 0x47c   : > { %1744 = vst [vmem:[%s3295_s17 + $0x70] sm:$0xff] %v1712_v48  ;;  %1745 = vst [vmem:[%s3295_s17 + $0x78] sm:$0xff] %v1713_v12  ;;  %v1683_v62 = vmul.f32 0.6931472, %v2422_v37 }
 0x47d   : > { %v1656_v11 = vpop.xlane.xlu0 %1655 }
 0x47e   : > { %v1714_v1 = vsub.f32 %v3227_v54, %v1683_v62  ;;  %v1715_v39 = vsub.f32 %v3230_v13, %v1683_v62  ;;  %2429 = vlog2.f32 %v1656_v11 }
 0x47f   : > { %v2424_v31 = vpop.eup %2423 }
 0x480   : > { %1746 = vst [vmem:[%s3295_s17 + $0x80] sm:$0xff] %v1714_v1  ;;  %1747 = vst [vmem:[%s3295_s17 + $0x88] sm:$0xff] %v1715_v39  ;;  %v1685_v15 = vmul.f32 0.6931472, %v2424_v31 }
 0x481   : > { %v1659_v29 = vpop.xlane.xlu1 %1658 }
 0x482   : > { %v1716_v32 = vsub.f32 %v3235_v45, %v1685_v15  ;;  %v1717_v55 = vsub.f32 %v3238_v40, %v1685_v15  ;;  %2431 = vlog2.f32 %v1659_v29 }
 0x483   : > { %v2426_v59 = vpop.eup %2425 }
 0x484   : > { %1748 = vst [vmem:[%s3295_s17 + $0x90] sm:$0xff] %v1716_v32  ;;  %1749 = vst [vmem:[%s3295_s17 + $0x98] sm:$0xff] %v1717_v55  ;;  %v1687_v54 = vmul.f32 0.6931472, %v2426_v59 }
 0x485   : > { %v1662_v13 = vpop.xlane.xlu0 %1661 }
 0x486   : > { %v1718_v22 = vsub.f32 %v3243_v6, %v1687_v54  ;;  %v1719_v60 = vsub.f32 %v3246_v16, %v1687_v54  ;;  %2433 = vlog2.f32 %v1662_v13 }
 0x487   : > { %v2428_v41 = vpop.eup %2427 }
 0x488   : > { %1750 = vst [vmem:[%s3295_s17 + $0xa0] sm:$0xff] %v1718_v22  ;;  %1751 = vst [vmem:[%s3295_s17 + $0xa8] sm:$0xff] %v1719_v60  ;;  %v1689_v45 = vmul.f32 0.6931472, %v2428_v41 }
 0x489   : > { %v1665_v40 = vpop.xlane.xlu1 %1664 }
 0x48a   : > { %v1720_v57 = vsub.f32 %v3251_v4, %v1689_v45  ;;  %v1721_v46 = vsub.f32 %v3254_v42, %v1689_v45  ;;  %2435 = vlog2.f32 %v1665_v40 }
 0x48b   : > { %v2430_v2 = vpop.eup %2429 }
 0x48c   : > { %1752 = vst [vmem:[%s3295_s17 + $0xb0] sm:$0xff] %v1720_v57  ;;  %1753 = vst [vmem:[%s3295_s17 + $0xb8] sm:$0xff] %v1721_v46  ;;  %v1691_v6 = vmul.f32 0.6931472, %v2430_v2 }
 0x48e   : > { %v1722_v16 = vsub.f32 %v3259_v50, %v1691_v6  ;;  %v1723_v27 = vsub.f32 %v3262_v47, %v1691_v6 }
 0x48f   : > { %v2432_v14 = vpop.eup %2431 }
 0x490   : > { %1754 = vst [vmem:[%s3295_s17 + $0xc0] sm:$0xff] %v1722_v16  ;;  %1755 = vst [vmem:[%s3295_s17 + $0xc8] sm:$0xff] %v1723_v27  ;;  %v1693_v4 = vmul.f32 0.6931472, %v2432_v14 }
 0x492   : > { %v1724_v42 = vsub.f32 %v3267_v19, %v1693_v4  ;;  %v1725_v36 = vsub.f32 %v3270_v33, %v1693_v4 }
 0x493   : > { %v2434_v38 = vpop.eup %2433 }
 0x494   : > { %1756 = vst [vmem:[%s3295_s17 + $0xd0] sm:$0xff] %v1724_v42  ;;  %1757 = vst [vmem:[%s3295_s17 + $0xd8] sm:$0xff] %v1725_v36  ;;  %v1695_v17 = vmul.f32 0.6931472, %v2434_v38 }
 0x496   : > { %v1726_v50 = vsub.f32 %v3275_v0, %v1695_v17  ;;  %v1727_v47 = vsub.f32 %v3278_v56, %v1695_v17 }
 0x497   : > { %v2436_v3 = vpop.eup %2435 }
 0x498   : > { %1758 = vst [vmem:[%s3295_s17 + $0xe0] sm:$0xff] %v1726_v50  ;;  %1759 = vst [vmem:[%s3295_s17 + $0xe8] sm:$0xff] %v1727_v47  ;;  %v1697_v19 = vmul.f32 0.6931472, %v2436_v3 }
 0x49a   : > { %v1728_v33 = vsub.f32 %v3283_v7, %v1697_v19  ;;  %v1729_v0 = vsub.f32 %v3286_v63, %v1697_v19 }
 0x49c   : > { %1760 = vst [vmem:[%s3295_s17 + $0xf0] sm:$0xff] %v1728_v33  ;;  %1761 = vst [vmem:[%s3295_s17 + $0xf8] sm:$0xff] %v1729_v0 }
 0x49d   : > { %2450 = shalt.err (!%p2447_p3)
}
 0x49e   : > { %s2451_s13 = scalar_lea.hbm %s3360_s28, 4096  ;;  %s2455_s16 = scalar_lea.hbm %s3416_s6, 8192 }
 0x49f   : > { %p2452_p4 = scmp.ne.s32.totalorder %s3360_s28, %s2451_s13  ;;  %p2456_p9 = scmp.lt.s32.totalorder %s3360_s28, %s3416_s6 }
 0x4a0   : > { %p2457_p10 = scmp.lt.s32.totalorder %s2455_s16, %s2451_s13 }
 0x4a1   : > { %p2453_p7 = pnand %p2452_p4, %p2578_p5 }
 0x4a2   : > { %p2458_p11 = por %p2457_p10, %p2456_p9 }
 0x4a3   : > { %p2454_p8 = pneg %p2453_p7 }
 0x4a5   : > { %p2459_p12 = pnand %p2458_p11, %p2454_p8 }
 0x4a7   : > { %2462 = shalt.err (!%p2459_p12)
}
 0x4a8   : > { %s2503_s18 = smov 256   ;;  %s2504_s20 = smov 16  }
 0x4a9   : > { %2239 = dma.vmem_to_hbm [thread:$0]  (%p2578_p5), %s3362_s19, 4096, %s3360_s28, %s3370_s25, %s2503_s18, %s2503_s18, %s2504_s20  }
 0x4aa PF: > { %p2245_p13 = scmp.ge.s32.totalorder %s2497_s24, 2  ;;  %s1792_s26 = sand.u32 1, %s2485_s21  }
 0x4ab   : > { %s1793_s9 = scalar_lea.sflag [#allocation3], %s1792_s26 }
 0x4ac   : > { %p2242_p0 = pnand %p2245_p13, %p2582_p6 }
 0x4ae   : > { %p2243_p1 = pneg %p2242_p0 }
 0x4b0   : > { %2480 = dma.done.wait (%p2243_p1), %s1793_s9, 4096  }
 0x4b1   : > { %2482 = vsyncadd (%p2243_p1), %s1793_s9, 4294963200  ;;  %p16_p2 = scmp.ge.s32.totalorder %s2565_s27, 4   ;;  %s3419_s21 = smov %s2489_s22 }
 0x4b2   : > { %s3420_s22 = smov %s2493_s23  ;;  %s3421_s23 = smov %s2576_s30 }
 0x4b3   : > { %s3422_s24 = smov %s2565_s27  ;;  %18 = sbr.rel (!%p16_p2) target bundleno = 3 (0x3), region = 79 }
 0x4b8   :  { %1798 = vsyncpa [#allocation3], 1 }
 0x4b9   :  { %1800 = vsyncpa [#allocation3 + $0x1], 1 }

</bundles_post_ra>
